<compile_context>
chip_gen: v5e
topology: v5e:2x2
jax: 0.10.0
libtpu: 0.0.40
codegen_flags: <defaults>
</compile_context>

<pallas_src>
import math

import numpy as np

import jax
import jax.numpy as jnp
from jax.experimental import pallas as pl
from jax.experimental.pallas import tpu as pltpu

NUM_HEADS = 3
HEAD_DIM = 19
QKV_DIM = NUM_HEADS * HEAD_DIM      # 57
LANE = 128                          # per-(q|k|v, head) segment lane padding
MASK_FILL = -9000000000000000.0     # python float -> inlined scalar literal


def _vmem():
    return pl.BlockSpec(memory_space=pltpu.MemorySpace.VMEM)


# ----------------------------- fused kernel ---------------------------------
def _mha_kernel(x_ref, adj_ref, wqkvb_ref, wfcb_ref, out_ref, yflat_ref):
    """Fused multi-head attention forward (eval mode).

    Ref shapes (all f32, fully VMEM resident at these sizes):
      x (S, F)            adj (S, S)
      wqkvb (F+1, 9*128)  fused/zero-padded QKV weights, last row = biases,
                          1/sqrt(D) already folded into the q segments
      wfcb  (57+1, F)     fc weight (transposed), last row = fc bias
      out (S, F)
      yflat (1, 57*S)     scratch: torch's contiguous (H, D, S) raw buffer
    """
    S, F = x_ref.shape
    x = x_ref[...]
    mask = adj_ref[...] > 0.0                          # hoisted out of head loop

    # One fused QKV projection: (S, F) @ (F, 9*128).  Padded lanes are zero
    # in both weight and bias, so they stay exactly zero downstream.
    w_qkv = wqkvb_ref[:F, :]
    b_qkv = wqkvb_ref[F:F + 1, :]
    qkv = jnp.dot(x, w_qkv, preferred_element_type=jnp.float32) + b_qkv   # (S, 9*128)

    for h in range(NUM_HEADS):                         # static unroll
        q_h = qkv[:, (0 * NUM_HEADS + h) * LANE:(0 * NUM_HEADS + h + 1) * LANE]
        k_h = qkv[:, (1 * NUM_HEADS + h) * LANE:(1 * NUM_HEADS + h + 1) * LANE]
        v_h = qkv[:, (2 * NUM_HEADS + h) * LANE:(2 * NUM_HEADS + h + 1) * LANE]

        # scores = (q / sqrt(D)) @ k^T   (scale folded into q weights/bias)
        scores = jax.lax.dot_general(q_h, k_h, (((1,), (1,)), ((), ())),
                                     preferred_element_type=jnp.float32)   # (S, S)

        m = jnp.max(scores, axis=-1, keepdims=True)
        e = jnp.exp(scores - m)
        attn = e / jnp.sum(e, axis=-1, keepdims=True)

        # Reference module masks AFTER softmax with -9e15 (reproduced exactly).
        attn = jnp.where(mask, attn, MASK_FILL)

        # Context already transposed: ctxT[d, s] = sum_t v[t, d] * attn[s, t]
        ctxT = jax.lax.dot_general(v_h, attn, (((0,), (1,)), ((), ())),
                                   preferred_element_type=jnp.float32)     # (128, S)

        # torch `(H, S, D).transpose(1, 2).contiguous()` raw buffer: row d of
        # the (D, S) slab occupies S contiguous slots at offset (h*D + d)*S.
        for d in range(HEAD_DIM):
            off = (h * HEAD_DIM + d) * S
            yflat_ref[:, off:off + S] = ctxT[d:d + 1, :]

    # `.view(S, H*D)`: row i of the scrambled matrix is flat[i*57:(i+1)*57].
    y = jnp.concatenate(
        [yflat_ref[:, i * QKV_DIM:(i + 1) * QKV_DIM] for i in range(S)], axis=0)  # (S, 57)

    # Single output projection (contraction on one axis, bias added once).
    w_fc = wfcb_ref[:QKV_DIM, :]
    b_fc = wfcb_ref[QKV_DIM:QKV_DIM + 1, :]
    out_ref[...] = jnp.dot(y, w_fc, preferred_element_type=jnp.float32) + b_fc


# ----------------------------- host-side packing ----------------------------
def init_params(key, in_features):
    """Deterministic nn.Linear-style init (uniform +-1/sqrt(fan_in)), torch layout."""
    def linear(k, fin, fout):
        kw, kb = jax.random.split(k)
        bound = 1.0 / math.sqrt(fin)
        w = jax.random.uniform(kw, (fout, fin), jnp.float32, -bound, bound)
        b = jax.random.uniform(kb, (fout,), jnp.float32, -bound, bound)
        return w, b

    keys = jax.random.split(key, 4)
    wq, bq = linear(keys[0], in_features, QKV_DIM)
    wk, bk = linear(keys[1], in_features, QKV_DIM)
    wv, bv = linear(keys[2], in_features, QKV_DIM)
    wfc, bfc = linear(keys[3], QKV_DIM, in_features)
    return dict(wq=wq, bq=bq, wk=wk, bk=bk, wv=wv, bv=bv, wfc=wfc, bfc=bfc)


def pack_params(params):
    """One-time host repack.

    wqkvb (F+1, 9*128): fused QKV weight; segment (t, h) = columns
      [(t*H + h)*128, +19) hold W_t rows for head h (scaled by 1/sqrt(D) for
      q); everything else zero; last row holds the (scaled) biases.
    wfcb (58, F): fc weight transposed, last row = fc bias.
    """
    assert HEAD_DIM <= LANE
    F = params["wq"].shape[1]
    scale = 1.0 / math.sqrt(HEAD_DIM)

    wqkvb = np.zeros((F + 1, 3 * NUM_HEADS * LANE), np.float32)
    for t, (wname, bname, sc) in enumerate(
            (("wq", "bq", scale), ("wk", "bk", 1.0), ("wv", "bv", 1.0))):
        w = np.asarray(params[wname], np.float32) * sc    # (H*D, F), torch layout
        b = np.asarray(params[bname], np.float32) * sc    # (H*D,)
        for h in range(NUM_HEADS):
            c0 = (t * NUM_HEADS + h) * LANE
            wqkvb[:F, c0:c0 + HEAD_DIM] = w[h * HEAD_DIM:(h + 1) * HEAD_DIM, :].T
            wqkvb[F, c0:c0 + HEAD_DIM] = b[h * HEAD_DIM:(h + 1) * HEAD_DIM]

    wfcb = np.concatenate(
        [np.asarray(params["wfc"], np.float32).T,          # (57, F)
         np.asarray(params["bfc"], np.float32)[None, :]],  # (1, F)
        axis=0)

    return dict(wqkvb=jnp.asarray(wqkvb), wfcb=jnp.asarray(wfcb))


def mha_forward(x, adj, packed):
    S, F = x.shape
    flops = (2 * S * F * 3 * NUM_HEADS * LANE          # fused QKV projection (padded)
             + NUM_HEADS * 4 * S * S * LANE            # scores + context per head
             + 2 * S * QKV_DIM * F)                    # single output projection
    bytes_accessed = 4 * (int(x.size) + int(adj.size) + int(packed["wqkvb"].size)
                          + int(packed["wfcb"].size) + S * F)
    cost = pl.CostEstimate(flops=flops, transcendentals=NUM_HEADS * S * S,
                           bytes_accessed=bytes_accessed)
    return pl.pallas_call(
        _mha_kernel,
        out_shape=jax.ShapeDtypeStruct((S, F), jnp.float32),
        in_specs=[_vmem()] * 4,
        out_specs=_vmem(),
        scratch_shapes=[pltpu.VMEM((1, QKV_DIM * S), jnp.float32)],
        cost_estimate=cost,
    )(x, adj, packed["wqkvb"], packed["wfcb"])


# ----------------------------- pure-JAX reference ---------------------------
def mha_reference(x, adj, params):
    """Pure-JAX mirror of the PyTorch module (eval mode), for self-checking."""
    S, _ = x.shape

    def lin(w, b):
        return x @ w.T + b

    q = lin(params["wq"], params["bq"]).reshape(S, NUM_HEADS, HEAD_DIM).transpose(1, 0, 2)
    k = lin(params["wk"], params["bk"]).reshape(S, NUM_HEADS, HEAD_DIM).transpose(1, 0, 2)
    v = lin(params["wv"], params["bv"]).reshape(S, NUM_HEADS, HEAD_DIM).transpose(1, 0, 2)
    aw = jnp.einsum('hqd,hkd->hqk', q, k) / math.sqrt(HEAD_DIM)
    aw = jax.nn.softmax(aw, axis=-1)
    aw = jnp.where(adj > 0, aw, MASK_FILL)
    ctx = jnp.einsum('hqk,hkd->hqd', aw, v)                    # (H, S, D)
    y = jnp.transpose(ctx, (0, 2, 1)).reshape(S, QKV_DIM)      # torch .transpose(1,2).view
    return y @ params["wfc"].T + params["bfc"]


if __name__ == "__main__":
    key = jax.random.PRNGKey(0)
    k_params, k_x, k_adj = jax.random.split(key, 3)

    S, F = 8, 16  # seq_len, in_features
    params = init_params(k_params, in_features=F)
    packed = pack_params(params)

    x = jax.random.normal(k_x, (S, F), jnp.float32)
    adj = (jax.random.uniform(k_adj, (S, S)) > 0.3).astype(jnp.float32)

    out = jax.block_until_ready(mha_forward(x, adj, packed))
    assert out.shape == (S, F), out.shape

    # (a) fully-connected adjacency -> normal-magnitude outputs, elementwise check.
    ones = jnp.ones((S, S), jnp.float32)
    out_u = jax.block_until_ready(mha_forward(x, ones, packed))
    ref_u = mha_reference(x, ones, params)
    assert jnp.allclose(out_u, ref_u, rtol=2e-2, atol=2e-3), "mismatch (unmasked)"

    # (b) masked adjacency -> outputs ~1e15 (post-softmax -9e15 mask flows into
    #     attn @ V), so compare on a max-magnitude-relative scale.
    ref = mha_reference(x, adj, params)
    err = jnp.max(jnp.abs(out - ref))
    assert err <= 1e-2 * jnp.max(jnp.abs(ref)) + 1e-3, "mismatch (masked)"

    print("KERNEL_OK")
</pallas_src>

<mosaic_0001>
module attributes {stable_mosaic.version = 11 : i64} {
  func.func @_mha_kernel(%arg0: memref<8x16xf32, #tpu.memory_space<vmem>>, %arg1: memref<8x8xf32, #tpu.memory_space<vmem>>, %arg2: memref<17x1152xf32, #tpu.memory_space<vmem>>, %arg3: memref<58x16xf32, #tpu.memory_space<vmem>>, %arg4: memref<8x16xf32, #tpu.memory_space<vmem>>, %arg5: memref<1x456xf32, #tpu.memory_space<vmem>>) attributes {dimension_semantics = [], scalar_prefetch = 0 : i64, scratch_operands = 1 : i64, tpu.core_type = #tpu.core_type<tc>} {
    %c0 = arith.constant 0 : index
    %c0_0 = arith.constant 0 : index
    %0 = vector.load %arg0[%c0, %c0_0] : memref<8x16xf32, #tpu.memory_space<vmem>>, vector<8x16xf32>
    %c0_1 = arith.constant 0 : index
    %c0_2 = arith.constant 0 : index
    %1 = vector.load %arg1[%c0_1, %c0_2] : memref<8x8xf32, #tpu.memory_space<vmem>>, vector<8x8xf32>
    %cst = arith.constant 0.000000e+00 : f32
    %2 = vector.broadcast %cst : f32 to vector<8x8xf32>
    %3 = arith.cmpf ogt, %1, %2 : vector<8x8xf32>
    %c0_3 = arith.constant 0 : index
    %c0_4 = arith.constant 0 : index
    %4 = vector.load %arg2[%c0_3, %c0_4] : memref<17x1152xf32, #tpu.memory_space<vmem>>, vector<16x1152xf32>
    %c16 = arith.constant 16 : index
    %c0_5 = arith.constant 0 : index
    %5 = vector.load %arg2[%c16, %c0_5] : memref<17x1152xf32, #tpu.memory_space<vmem>>, vector<1x1152xf32>
    %cst_6 = arith.constant dense<0.000000e+00> : vector<8x1152xf32>
    %6 = tpu.matmul %0, %4, %cst_6 {dimension_numbers = #tpu.dot_dimension_numbers<[1], [0], [0], [1], [0, 0, 1, 1], [], []>} : vector<8x16xf32>, vector<16x1152xf32>, vector<8x1152xf32> -> vector<8x1152xf32>
    %7 = vector.broadcast %5 : vector<1x1152xf32> to vector<8x1152xf32>
    %8 = arith.addf %6, %7 : vector<8x1152xf32>
    %9 = vector.extract_strided_slice %8 {offsets = [0, 0], sizes = [8, 128], strides = [1, 1]} : vector<8x1152xf32> to vector<8x128xf32>
    %10 = vector.extract_strided_slice %8 {offsets = [0, 384], sizes = [8, 128], strides = [1, 1]} : vector<8x1152xf32> to vector<8x128xf32>
    %11 = vector.extract_strided_slice %8 {offsets = [0, 768], sizes = [8, 128], strides = [1, 1]} : vector<8x1152xf32> to vector<8x128xf32>
    %cst_7 = arith.constant dense<0.000000e+00> : vector<8x8xf32>
    %12 = tpu.matmul %9, %10, %cst_7 {dimension_numbers = #tpu.dot_dimension_numbers<[1], [1], [0], [0], [0, 0, 1, 0], [], []>} : vector<8x128xf32>, vector<8x128xf32>, vector<8x8xf32> -> vector<8x8xf32>
    %cst_8 = arith.constant dense<0xFF800000> : vector<8xf32>
    %13 = vector.multi_reduction <maximumf>, %12, %cst_8 [1] : vector<8x8xf32> to vector<8xf32>
    %14 = vector.shape_cast %13 : vector<8xf32> to vector<8x1xf32>
    %15 = vector.broadcast %14 : vector<8x1xf32> to vector<8x8xf32>
    %16 = arith.subf %12, %15 : vector<8x8xf32>
    %17 = math.exp %16 : vector<8x8xf32>
    %cst_9 = arith.constant dense<0.000000e+00> : vector<8xf32>
    %18 = vector.multi_reduction <add>, %17, %cst_9 [1] : vector<8x8xf32> to vector<8xf32>
    %19 = vector.shape_cast %18 : vector<8xf32> to vector<8x1xf32>
    %20 = vector.broadcast %19 : vector<8x1xf32> to vector<8x8xf32>
    %21 = arith.divf %17, %20 : vector<8x8xf32>
    %cst_10 = arith.constant -9.000000e+15 : f32
    %22 = vector.broadcast %cst_10 : f32 to vector<8x8xf32>
    %23 = arith.select %3, %21, %22 : vector<8x8xi1>, vector<8x8xf32>
    %cst_11 = arith.constant dense<0.000000e+00> : vector<128x8xf32>
    %24 = tpu.matmul %11, %23, %cst_11 {dimension_numbers = #tpu.dot_dimension_numbers<[0], [1], [1], [0], [0, 1, 1, 0], [], []>} : vector<8x128xf32>, vector<8x8xf32>, vector<128x8xf32> -> vector<128x8xf32>
    %25 = vector.extract_strided_slice %24 {offsets = [0, 0], sizes = [1, 8], strides = [1, 1]} : vector<128x8xf32> to vector<1x8xf32>
    %c0_12 = arith.constant 0 : index
    %c0_13 = arith.constant 0 : index
    %26 = vector.load %arg5[%c0_12, %c0_13] : memref<1x456xf32, #tpu.memory_space<vmem>>, vector<1x8xf32>
    tpu.vector_store %arg5[%c0_12, %c0_13], %25 {strides = array<i32>} : memref<1x456xf32, #tpu.memory_space<vmem>>, vector<1x8xf32>,
    %27 = vector.extract_strided_slice %24 {offsets = [1, 0], sizes = [1, 8], strides = [1, 1]} : vector<128x8xf32> to vector<1x8xf32>
    %c0_14 = arith.constant 0 : index
    %c8 = arith.constant 8 : index
    %28 = vector.load %arg5[%c0_14, %c8] : memref<1x456xf32, #tpu.memory_space<vmem>>, vector<1x8xf32>
    tpu.vector_store %arg5[%c0_14, %c8], %27 {strides = array<i32>} : memref<1x456xf32, #tpu.memory_space<vmem>>, vector<1x8xf32>,
    %29 = vector.extract_strided_slice %24 {offsets = [2, 0], sizes = [1, 8], strides = [1, 1]} : vector<128x8xf32> to vector<1x8xf32>
    %c0_15 = arith.constant 0 : index
    %c16_16 = arith.constant 16 : index
    %30 = vector.load %arg5[%c0_15, %c16_16] : memref<1x456xf32, #tpu.memory_space<vmem>>, vector<1x8xf32>
    tpu.vector_store %arg5[%c0_15, %c16_16], %29 {strides = array<i32>} : memref<1x456xf32, #tpu.memory_space<vmem>>, vector<1x8xf32>,
    %31 = vector.extract_strided_slice %24 {offsets = [3, 0], sizes = [1, 8], strides = [1, 1]} : vector<128x8xf32> to vector<1x8xf32>
    %c0_17 = arith.constant 0 : index
    %c24 = arith.constant 24 : index
    %32 = vector.load %arg5[%c0_17, %c24] : memref<1x456xf32, #tpu.memory_space<vmem>>, vector<1x8xf32>
    tpu.vector_store %arg5[%c0_17, %c24], %31 {strides = array<i32>} : memref<1x456xf32, #tpu.memory_space<vmem>>, vector<1x8xf32>,
    %33 = vector.extract_strided_slice %24 {offsets = [4, 0], sizes = [1, 8], strides = [1, 1]} : vector<128x8xf32> to vector<1x8xf32>
    %c0_18 = arith.constant 0 : index
    %c32 = arith.constant 32 : index
    %34 = vector.load %arg5[%c0_18, %c32] : memref<1x456xf32, #tpu.memory_space<vmem>>, vector<1x8xf32>
    tpu.vector_store %arg5[%c0_18, %c32], %33 {strides = array<i32>} : memref<1x456xf32, #tpu.memory_space<vmem>>, vector<1x8xf32>,
    %35 = vector.extract_strided_slice %24 {offsets = [5, 0], sizes = [1, 8], strides = [1, 1]} : vector<128x8xf32> to vector<1x8xf32>
    %c0_19 = arith.constant 0 : index
    %c40 = arith.constant 40 : index
    %36 = vector.load %arg5[%c0_19, %c40] : memref<1x456xf32, #tpu.memory_space<vmem>>, vector<1x8xf32>
    tpu.vector_store %arg5[%c0_19, %c40], %35 {strides = array<i32>} : memref<1x456xf32, #tpu.memory_space<vmem>>, vector<1x8xf32>,
    %37 = vector.extract_strided_slice %24 {offsets = [6, 0], sizes = [1, 8], strides = [1, 1]} : vector<128x8xf32> to vector<1x8xf32>
    %c0_20 = arith.constant 0 : index
    %c48 = arith.constant 48 : index
    %38 = vector.load %arg5[%c0_20, %c48] : memref<1x456xf32, #tpu.memory_space<vmem>>, vector<1x8xf32>
    tpu.vector_store %arg5[%c0_20, %c48], %37 {strides = array<i32>} : memref<1x456xf32, #tpu.memory_space<vmem>>, vector<1x8xf32>,
    %39 = vector.extract_strided_slice %24 {offsets = [7, 0], sizes = [1, 8], strides = [1, 1]} : vector<128x8xf32> to vector<1x8xf32>
    %c0_21 = arith.constant 0 : index
    %c56 = arith.constant 56 : index
    %40 = vector.load %arg5[%c0_21, %c56] : memref<1x456xf32, #tpu.memory_space<vmem>>, vector<1x8xf32>
    tpu.vector_store %arg5[%c0_21, %c56], %39 {strides = array<i32>} : memref<1x456xf32, #tpu.memory_space<vmem>>, vector<1x8xf32>,
    %41 = vector.extract_strided_slice %24 {offsets = [8, 0], sizes = [1, 8], strides = [1, 1]} : vector<128x8xf32> to vector<1x8xf32>
    %c0_22 = arith.constant 0 : index
    %c64 = arith.constant 64 : index
    %42 = vector.load %arg5[%c0_22, %c64] : memref<1x456xf32, #tpu.memory_space<vmem>>, vector<1x8xf32>
    tpu.vector_store %arg5[%c0_22, %c64], %41 {strides = array<i32>} : memref<1x456xf32, #tpu.memory_space<vmem>>, vector<1x8xf32>,
    %43 = vector.extract_strided_slice %24 {offsets = [9, 0], sizes = [1, 8], strides = [1, 1]} : vector<128x8xf32> to vector<1x8xf32>
    %c0_23 = arith.constant 0 : index
    %c72 = arith.constant 72 : index
    %44 = vector.load %arg5[%c0_23, %c72] : memref<1x456xf32, #tpu.memory_space<vmem>>, vector<1x8xf32>
    tpu.vector_store %arg5[%c0_23, %c72], %43 {strides = array<i32>} : memref<1x456xf32, #tpu.memory_space<vmem>>, vector<1x8xf32>,
    %45 = vector.extract_strided_slice %24 {offsets = [10, 0], sizes = [1, 8], strides = [1, 1]} : vector<128x8xf32> to vector<1x8xf32>
    %c0_24 = arith.constant 0 : index
    %c80 = arith.constant 80 : index
    %46 = vector.load %arg5[%c0_24, %c80] : memref<1x456xf32, #tpu.memory_space<vmem>>, vector<1x8xf32>
    tpu.vector_store %arg5[%c0_24, %c80], %45 {strides = array<i32>} : memref<1x456xf32, #tpu.memory_space<vmem>>, vector<1x8xf32>,
    %47 = vector.extract_strided_slice %24 {offsets = [11, 0], sizes = [1, 8], strides = [1, 1]} : vector<128x8xf32> to vector<1x8xf32>
    %c0_25 = arith.constant 0 : index
    %c88 = arith.constant 88 : index
    %48 = vector.load %arg5[%c0_25, %c88] : memref<1x456xf32, #tpu.memory_space<vmem>>, vector<1x8xf32>
    tpu.vector_store %arg5[%c0_25, %c88], %47 {strides = array<i32>} : memref<1x456xf32, #tpu.memory_space<vmem>>, vector<1x8xf32>,
    %49 = vector.extract_strided_slice %24 {offsets = [12, 0], sizes = [1, 8], strides = [1, 1]} : vector<128x8xf32> to vector<1x8xf32>
    %c0_26 = arith.constant 0 : index
    %c96 = arith.constant 96 : index
    %50 = vector.load %arg5[%c0_26, %c96] : memref<1x456xf32, #tpu.memory_space<vmem>>, vector<1x8xf32>
    tpu.vector_store %arg5[%c0_26, %c96], %49 {strides = array<i32>} : memref<1x456xf32, #tpu.memory_space<vmem>>, vector<1x8xf32>,
    %51 = vector.extract_strided_slice %24 {offsets = [13, 0], sizes = [1, 8], strides = [1, 1]} : vector<128x8xf32> to vector<1x8xf32>
    %c0_27 = arith.constant 0 : index
    %c104 = arith.constant 104 : index
    %52 = vector.load %arg5[%c0_27, %c104] : memref<1x456xf32, #tpu.memory_space<vmem>>, vector<1x8xf32>
    tpu.vector_store %arg5[%c0_27, %c104], %51 {strides = array<i32>} : memref<1x456xf32, #tpu.memory_space<vmem>>, vector<1x8xf32>,
    %53 = vector.extract_strided_slice %24 {offsets = [14, 0], sizes = [1, 8], strides = [1, 1]} : vector<128x8xf32> to vector<1x8xf32>
    %c0_28 = arith.constant 0 : index
    %c112 = arith.constant 112 : index
    %54 = vector.load %arg5[%c0_28, %c112] : memref<1x456xf32, #tpu.memory_space<vmem>>, vector<1x8xf32>
    tpu.vector_store %arg5[%c0_28, %c112], %53 {strides = array<i32>} : memref<1x456xf32, #tpu.memory_space<vmem>>, vector<1x8xf32>,
    %55 = vector.extract_strided_slice %24 {offsets = [15, 0], sizes = [1, 8], strides = [1, 1]} : vector<128x8xf32> to vector<1x8xf32>
    %c0_29 = arith.constant 0 : index
    %c120 = arith.constant 120 : index
    %56 = vector.load %arg5[%c0_29, %c120] : memref<1x456xf32, #tpu.memory_space<vmem>>, vector<1x8xf32>
    tpu.vector_store %arg5[%c0_29, %c120], %55 {strides = array<i32>} : memref<1x456xf32, #tpu.memory_space<vmem>>, vector<1x8xf32>,
    %57 = vector.extract_strided_slice %24 {offsets = [16, 0], sizes = [1, 8], strides = [1, 1]} : vector<128x8xf32> to vector<1x8xf32>
    %c0_30 = arith.constant 0 : index
    %c128 = arith.constant 128 : index
    %58 = vector.load %arg5[%c0_30, %c128] : memref<1x456xf32, #tpu.memory_space<vmem>>, vector<1x8xf32>
    tpu.vector_store %arg5[%c0_30, %c128], %57 {strides = array<i32>} : memref<1x456xf32, #tpu.memory_space<vmem>>, vector<1x8xf32>,
    %59 = vector.extract_strided_slice %24 {offsets = [17, 0], sizes = [1, 8], strides = [1, 1]} : vector<128x8xf32> to vector<1x8xf32>
    %c0_31 = arith.constant 0 : index
    %c136 = arith.constant 136 : index
    %60 = vector.load %arg5[%c0_31, %c136] : memref<1x456xf32, #tpu.memory_space<vmem>>, vector<1x8xf32>
    tpu.vector_store %arg5[%c0_31, %c136], %59 {strides = array<i32>} : memref<1x456xf32, #tpu.memory_space<vmem>>, vector<1x8xf32>,
    %61 = vector.extract_strided_slice %24 {offsets = [18, 0], sizes = [1, 8], strides = [1, 1]} : vector<128x8xf32> to vector<1x8xf32>
    %c0_32 = arith.constant 0 : index
    %c144 = arith.constant 144 : index
    %62 = vector.load %arg5[%c0_32, %c144] : memref<1x456xf32, #tpu.memory_space<vmem>>, vector<1x8xf32>
    tpu.vector_store %arg5[%c0_32, %c144], %61 {strides = array<i32>} : memref<1x456xf32, #tpu.memory_space<vmem>>, vector<1x8xf32>,
    %63 = vector.extract_strided_slice %8 {offsets = [0, 128], sizes = [8, 128], strides = [1, 1]} : vector<8x1152xf32> to vector<8x128xf32>
    %64 = vector.extract_strided_slice %8 {offsets = [0, 512], sizes = [8, 128], strides = [1, 1]} : vector<8x1152xf32> to vector<8x128xf32>
    %65 = vector.extract_strided_slice %8 {offsets = [0, 896], sizes = [8, 128], strides = [1, 1]} : vector<8x1152xf32> to vector<8x128xf32>
    %cst_33 = arith.constant dense<0.000000e+00> : vector<8x8xf32>
    %66 = tpu.matmul %63, %64, %cst_33 {dimension_numbers = #tpu.dot_dimension_numbers<[1], [1], [0], [0], [0, 0, 1, 0], [], []>} : vector<8x128xf32>, vector<8x128xf32>, vector<8x8xf32> -> vector<8x8xf32>
    %cst_34 = arith.constant dense<0xFF800000> : vector<8xf32>
    %67 = vector.multi_reduction <maximumf>, %66, %cst_34 [1] : vector<8x8xf32> to vector<8xf32>
    %68 = vector.shape_cast %67 : vector<8xf32> to vector<8x1xf32>
    %69 = vector.broadcast %68 : vector<8x1xf32> to vector<8x8xf32>
    %70 = arith.subf %66, %69 : vector<8x8xf32>
    %71 = math.exp %70 : vector<8x8xf32>
    %cst_35 = arith.constant dense<0.000000e+00> : vector<8xf32>
    %72 = vector.multi_reduction <add>, %71, %cst_35 [1] : vector<8x8xf32> to vector<8xf32>
    %73 = vector.shape_cast %72 : vector<8xf32> to vector<8x1xf32>
    %74 = vector.broadcast %73 : vector<8x1xf32> to vector<8x8xf32>
    %75 = arith.divf %71, %74 : vector<8x8xf32>
    %cst_36 = arith.constant -9.000000e+15 : f32
    %76 = vector.broadcast %cst_36 : f32 to vector<8x8xf32>
    %77 = arith.select %3, %75, %76 : vector<8x8xi1>, vector<8x8xf32>
    %cst_37 = arith.constant dense<0.000000e+00> : vector<128x8xf32>
    %78 = tpu.matmul %65, %77, %cst_37 {dimension_numbers = #tpu.dot_dimension_numbers<[0], [1], [1], [0], [0, 1, 1, 0], [], []>} : vector<8x128xf32>, vector<8x8xf32>, vector<128x8xf32> -> vector<128x8xf32>
    %79 = vector.extract_strided_slice %78 {offsets = [0, 0], sizes = [1, 8], strides = [1, 1]} : vector<128x8xf32> to vector<1x8xf32>
    %c0_38 = arith.constant 0 : index
    %c152 = arith.constant 152 : index
    %80 = vector.load %arg5[%c0_38, %c152] : memref<1x456xf32, #tpu.memory_space<vmem>>, vector<1x8xf32>
    tpu.vector_store %arg5[%c0_38, %c152], %79 {strides = array<i32>} : memref<1x456xf32, #tpu.memory_space<vmem>>, vector<1x8xf32>,
    %81 = vector.extract_strided_slice %78 {offsets = [1, 0], sizes = [1, 8], strides = [1, 1]} : vector<128x8xf32> to vector<1x8xf32>
    %c0_39 = arith.constant 0 : index
    %c160 = arith.constant 160 : index
    %82 = vector.load %arg5[%c0_39, %c160] : memref<1x456xf32, #tpu.memory_space<vmem>>, vector<1x8xf32>
    tpu.vector_store %arg5[%c0_39, %c160], %81 {strides = array<i32>} : memref<1x456xf32, #tpu.memory_space<vmem>>, vector<1x8xf32>,
    %83 = vector.extract_strided_slice %78 {offsets = [2, 0], sizes = [1, 8], strides = [1, 1]} : vector<128x8xf32> to vector<1x8xf32>
    %c0_40 = arith.constant 0 : index
    %c168 = arith.constant 168 : index
    %84 = vector.load %arg5[%c0_40, %c168] : memref<1x456xf32, #tpu.memory_space<vmem>>, vector<1x8xf32>
    tpu.vector_store %arg5[%c0_40, %c168], %83 {strides = array<i32>} : memref<1x456xf32, #tpu.memory_space<vmem>>, vector<1x8xf32>,
    %85 = vector.extract_strided_slice %78 {offsets = [3, 0], sizes = [1, 8], strides = [1, 1]} : vector<128x8xf32> to vector<1x8xf32>
    %c0_41 = arith.constant 0 : index
    %c176 = arith.constant 176 : index
    %86 = vector.load %arg5[%c0_41, %c176] : memref<1x456xf32, #tpu.memory_space<vmem>>, vector<1x8xf32>
    tpu.vector_store %arg5[%c0_41, %c176], %85 {strides = array<i32>} : memref<1x456xf32, #tpu.memory_space<vmem>>, vector<1x8xf32>,
    %87 = vector.extract_strided_slice %78 {offsets = [4, 0], sizes = [1, 8], strides = [1, 1]} : vector<128x8xf32> to vector<1x8xf32>
    %c0_42 = arith.constant 0 : index
    %c184 = arith.constant 184 : index
    %88 = vector.load %arg5[%c0_42, %c184] : memref<1x456xf32, #tpu.memory_space<vmem>>, vector<1x8xf32>
    tpu.vector_store %arg5[%c0_42, %c184], %87 {strides = array<i32>} : memref<1x456xf32, #tpu.memory_space<vmem>>, vector<1x8xf32>,
    %89 = vector.extract_strided_slice %78 {offsets = [5, 0], sizes = [1, 8], strides = [1, 1]} : vector<128x8xf32> to vector<1x8xf32>
    %c0_43 = arith.constant 0 : index
    %c192 = arith.constant 192 : index
    %90 = vector.load %arg5[%c0_43, %c192] : memref<1x456xf32, #tpu.memory_space<vmem>>, vector<1x8xf32>
    tpu.vector_store %arg5[%c0_43, %c192], %89 {strides = array<i32>} : memref<1x456xf32, #tpu.memory_space<vmem>>, vector<1x8xf32>,
    %91 = vector.extract_strided_slice %78 {offsets = [6, 0], sizes = [1, 8], strides = [1, 1]} : vector<128x8xf32> to vector<1x8xf32>
    %c0_44 = arith.constant 0 : index
    %c200 = arith.constant 200 : index
    %92 = vector.load %arg5[%c0_44, %c200] : memref<1x456xf32, #tpu.memory_space<vmem>>, vector<1x8xf32>
    tpu.vector_store %arg5[%c0_44, %c200], %91 {strides = array<i32>} : memref<1x456xf32, #tpu.memory_space<vmem>>, vector<1x8xf32>,
    %93 = vector.extract_strided_slice %78 {offsets = [7, 0], sizes = [1, 8], strides = [1, 1]} : vector<128x8xf32> to vector<1x8xf32>
    %c0_45 = arith.constant 0 : index
    %c208 = arith.constant 208 : index
    %94 = vector.load %arg5[%c0_45, %c208] : memref<1x456xf32, #tpu.memory_space<vmem>>, vector<1x8xf32>
    tpu.vector_store %arg5[%c0_45, %c208], %93 {strides = array<i32>} : memref<1x456xf32, #tpu.memory_space<vmem>>, vector<1x8xf32>,
    %95 = vector.extract_strided_slice %78 {offsets = [8, 0], sizes = [1, 8], strides = [1, 1]} : vector<128x8xf32> to vector<1x8xf32>
    %c0_46 = arith.constant 0 : index
    %c216 = arith.constant 216 : index
    %96 = vector.load %arg5[%c0_46, %c216] : memref<1x456xf32, #tpu.memory_space<vmem>>, vector<1x8xf32>
    tpu.vector_store %arg5[%c0_46, %c216], %95 {strides = array<i32>} : memref<1x456xf32, #tpu.memory_space<vmem>>, vector<1x8xf32>,
    %97 = vector.extract_strided_slice %78 {offsets = [9, 0], sizes = [1, 8], strides = [1, 1]} : vector<128x8xf32> to vector<1x8xf32>
    %c0_47 = arith.constant 0 : index
    %c224 = arith.constant 224 : index
    %98 = vector.load %arg5[%c0_47, %c224] : memref<1x456xf32, #tpu.memory_space<vmem>>, vector<1x8xf32>
    tpu.vector_store %arg5[%c0_47, %c224], %97 {strides = array<i32>} : memref<1x456xf32, #tpu.memory_space<vmem>>, vector<1x8xf32>,
    %99 = vector.extract_strided_slice %78 {offsets = [10, 0], sizes = [1, 8], strides = [1, 1]} : vector<128x8xf32> to vector<1x8xf32>
    %c0_48 = arith.constant 0 : index
    %c232 = arith.constant 232 : index
    %100 = vector.load %arg5[%c0_48, %c232] : memref<1x456xf32, #tpu.memory_space<vmem>>, vector<1x8xf32>
    tpu.vector_store %arg5[%c0_48, %c232], %99 {strides = array<i32>} : memref<1x456xf32, #tpu.memory_space<vmem>>, vector<1x8xf32>,
    %101 = vector.extract_strided_slice %78 {offsets = [11, 0], sizes = [1, 8], strides = [1, 1]} : vector<128x8xf32> to vector<1x8xf32>
    %c0_49 = arith.constant 0 : index
    %c240 = arith.constant 240 : index
    %102 = vector.load %arg5[%c0_49, %c240] : memref<1x456xf32, #tpu.memory_space<vmem>>, vector<1x8xf32>
    tpu.vector_store %arg5[%c0_49, %c240], %101 {strides = array<i32>} : memref<1x456xf32, #tpu.memory_space<vmem>>, vector<1x8xf32>,
    %103 = vector.extract_strided_slice %78 {offsets = [12, 0], sizes = [1, 8], strides = [1, 1]} : vector<128x8xf32> to vector<1x8xf32>
    %c0_50 = arith.constant 0 : index
    %c248 = arith.constant 248 : index
    %104 = vector.load %arg5[%c0_50, %c248] : memref<1x456xf32, #tpu.memory_space<vmem>>, vector<1x8xf32>
    tpu.vector_store %arg5[%c0_50, %c248], %103 {strides = array<i32>} : memref<1x456xf32, #tpu.memory_space<vmem>>, vector<1x8xf32>,
    %105 = vector.extract_strided_slice %78 {offsets = [13, 0], sizes = [1, 8], strides = [1, 1]} : vector<128x8xf32> to vector<1x8xf32>
    %c0_51 = arith.constant 0 : index
    %c256 = arith.constant 256 : index
    %106 = vector.load %arg5[%c0_51, %c256] : memref<1x456xf32, #tpu.memory_space<vmem>>, vector<1x8xf32>
    tpu.vector_store %arg5[%c0_51, %c256], %105 {strides = array<i32>} : memref<1x456xf32, #tpu.memory_space<vmem>>, vector<1x8xf32>,
    %107 = vector.extract_strided_slice %78 {offsets = [14, 0], sizes = [1, 8], strides = [1, 1]} : vector<128x8xf32> to vector<1x8xf32>
    %c0_52 = arith.constant 0 : index
    %c264 = arith.constant 264 : index
    %108 = vector.load %arg5[%c0_52, %c264] : memref<1x456xf32, #tpu.memory_space<vmem>>, vector<1x8xf32>
    tpu.vector_store %arg5[%c0_52, %c264], %107 {strides = array<i32>} : memref<1x456xf32, #tpu.memory_space<vmem>>, vector<1x8xf32>,
    %109 = vector.extract_strided_slice %78 {offsets = [15, 0], sizes = [1, 8], strides = [1, 1]} : vector<128x8xf32> to vector<1x8xf32>
    %c0_53 = arith.constant 0 : index
    %c272 = arith.constant 272 : index
    %110 = vector.load %arg5[%c0_53, %c272] : memref<1x456xf32, #tpu.memory_space<vmem>>, vector<1x8xf32>
    tpu.vector_store %arg5[%c0_53, %c272], %109 {strides = array<i32>} : memref<1x456xf32, #tpu.memory_space<vmem>>, vector<1x8xf32>,
    %111 = vector.extract_strided_slice %78 {offsets = [16, 0], sizes = [1, 8], strides = [1, 1]} : vector<128x8xf32> to vector<1x8xf32>
    %c0_54 = arith.constant 0 : index
    %c280 = arith.constant 280 : index
    %112 = vector.load %arg5[%c0_54, %c280] : memref<1x456xf32, #tpu.memory_space<vmem>>, vector<1x8xf32>
    tpu.vector_store %arg5[%c0_54, %c280], %111 {strides = array<i32>} : memref<1x456xf32, #tpu.memory_space<vmem>>, vector<1x8xf32>,
    %113 = vector.extract_strided_slice %78 {offsets = [17, 0], sizes = [1, 8], strides = [1, 1]} : vector<128x8xf32> to vector<1x8xf32>
    %c0_55 = arith.constant 0 : index
    %c288 = arith.constant 288 : index
    %114 = vector.load %arg5[%c0_55, %c288] : memref<1x456xf32, #tpu.memory_space<vmem>>, vector<1x8xf32>
    tpu.vector_store %arg5[%c0_55, %c288], %113 {strides = array<i32>} : memref<1x456xf32, #tpu.memory_space<vmem>>, vector<1x8xf32>,
    %115 = vector.extract_strided_slice %78 {offsets = [18, 0], sizes = [1, 8], strides = [1, 1]} : vector<128x8xf32> to vector<1x8xf32>
    %c0_56 = arith.constant 0 : index
    %c296 = arith.constant 296 : index
    %116 = vector.load %arg5[%c0_56, %c296] : memref<1x456xf32, #tpu.memory_space<vmem>>, vector<1x8xf32>
    tpu.vector_store %arg5[%c0_56, %c296], %115 {strides = array<i32>} : memref<1x456xf32, #tpu.memory_space<vmem>>, vector<1x8xf32>,
    %117 = vector.extract_strided_slice %8 {offsets = [0, 256], sizes = [8, 128], strides = [1, 1]} : vector<8x1152xf32> to vector<8x128xf32>
    %118 = vector.extract_strided_slice %8 {offsets = [0, 640], sizes = [8, 128], strides = [1, 1]} : vector<8x1152xf32> to vector<8x128xf32>
    %119 = vector.extract_strided_slice %8 {offsets = [0, 1024], sizes = [8, 128], strides = [1, 1]} : vector<8x1152xf32> to vector<8x128xf32>
    %cst_57 = arith.constant dense<0.000000e+00> : vector<8x8xf32>
    %120 = tpu.matmul %117, %118, %cst_57 {dimension_numbers = #tpu.dot_dimension_numbers<[1], [1], [0], [0], [0, 0, 1, 0], [], []>} : vector<8x128xf32>, vector<8x128xf32>, vector<8x8xf32> -> vector<8x8xf32>
    %cst_58 = arith.constant dense<0xFF800000> : vector<8xf32>
    %121 = vector.multi_reduction <maximumf>, %120, %cst_58 [1] : vector<8x8xf32> to vector<8xf32>
    %122 = vector.shape_cast %121 : vector<8xf32> to vector<8x1xf32>
    %123 = vector.broadcast %122 : vector<8x1xf32> to vector<8x8xf32>
    %124 = arith.subf %120, %123 : vector<8x8xf32>
    %125 = math.exp %124 : vector<8x8xf32>
    %cst_59 = arith.constant dense<0.000000e+00> : vector<8xf32>
    %126 = vector.multi_reduction <add>, %125, %cst_59 [1] : vector<8x8xf32> to vector<8xf32>
    %127 = vector.shape_cast %126 : vector<8xf32> to vector<8x1xf32>
    %128 = vector.broadcast %127 : vector<8x1xf32> to vector<8x8xf32>
    %129 = arith.divf %125, %128 : vector<8x8xf32>
    %cst_60 = arith.constant -9.000000e+15 : f32
    %130 = vector.broadcast %cst_60 : f32 to vector<8x8xf32>
    %131 = arith.select %3, %129, %130 : vector<8x8xi1>, vector<8x8xf32>
    %cst_61 = arith.constant dense<0.000000e+00> : vector<128x8xf32>
    %132 = tpu.matmul %119, %131, %cst_61 {dimension_numbers = #tpu.dot_dimension_numbers<[0], [1], [1], [0], [0, 1, 1, 0], [], []>} : vector<8x128xf32>, vector<8x8xf32>, vector<128x8xf32> -> vector<128x8xf32>
    %133 = vector.extract_strided_slice %132 {offsets = [0, 0], sizes = [1, 8], strides = [1, 1]} : vector<128x8xf32> to vector<1x8xf32>
    %c0_62 = arith.constant 0 : index
    %c304 = arith.constant 304 : index
    %134 = vector.load %arg5[%c0_62, %c304] : memref<1x456xf32, #tpu.memory_space<vmem>>, vector<1x8xf32>
    tpu.vector_store %arg5[%c0_62, %c304], %133 {strides = array<i32>} : memref<1x456xf32, #tpu.memory_space<vmem>>, vector<1x8xf32>,
    %135 = vector.extract_strided_slice %132 {offsets = [1, 0], sizes = [1, 8], strides = [1, 1]} : vector<128x8xf32> to vector<1x8xf32>
    %c0_63 = arith.constant 0 : index
    %c312 = arith.constant 312 : index
    %136 = vector.load %arg5[%c0_63, %c312] : memref<1x456xf32, #tpu.memory_space<vmem>>, vector<1x8xf32>
    tpu.vector_store %arg5[%c0_63, %c312], %135 {strides = array<i32>} : memref<1x456xf32, #tpu.memory_space<vmem>>, vector<1x8xf32>,
    %137 = vector.extract_strided_slice %132 {offsets = [2, 0], sizes = [1, 8], strides = [1, 1]} : vector<128x8xf32> to vector<1x8xf32>
    %c0_64 = arith.constant 0 : index
    %c320 = arith.constant 320 : index
    %138 = vector.load %arg5[%c0_64, %c320] : memref<1x456xf32, #tpu.memory_space<vmem>>, vector<1x8xf32>
    tpu.vector_store %arg5[%c0_64, %c320], %137 {strides = array<i32>} : memref<1x456xf32, #tpu.memory_space<vmem>>, vector<1x8xf32>,
    %139 = vector.extract_strided_slice %132 {offsets = [3, 0], sizes = [1, 8], strides = [1, 1]} : vector<128x8xf32> to vector<1x8xf32>
    %c0_65 = arith.constant 0 : index
    %c328 = arith.constant 328 : index
    %140 = vector.load %arg5[%c0_65, %c328] : memref<1x456xf32, #tpu.memory_space<vmem>>, vector<1x8xf32>
    tpu.vector_store %arg5[%c0_65, %c328], %139 {strides = array<i32>} : memref<1x456xf32, #tpu.memory_space<vmem>>, vector<1x8xf32>,
    %141 = vector.extract_strided_slice %132 {offsets = [4, 0], sizes = [1, 8], strides = [1, 1]} : vector<128x8xf32> to vector<1x8xf32>
    %c0_66 = arith.constant 0 : index
    %c336 = arith.constant 336 : index
    %142 = vector.load %arg5[%c0_66, %c336] : memref<1x456xf32, #tpu.memory_space<vmem>>, vector<1x8xf32>
    tpu.vector_store %arg5[%c0_66, %c336], %141 {strides = array<i32>} : memref<1x456xf32, #tpu.memory_space<vmem>>, vector<1x8xf32>,
    %143 = vector.extract_strided_slice %132 {offsets = [5, 0], sizes = [1, 8], strides = [1, 1]} : vector<128x8xf32> to vector<1x8xf32>
    %c0_67 = arith.constant 0 : index
    %c344 = arith.constant 344 : index
    %144 = vector.load %arg5[%c0_67, %c344] : memref<1x456xf32, #tpu.memory_space<vmem>>, vector<1x8xf32>
    tpu.vector_store %arg5[%c0_67, %c344], %143 {strides = array<i32>} : memref<1x456xf32, #tpu.memory_space<vmem>>, vector<1x8xf32>,
    %145 = vector.extract_strided_slice %132 {offsets = [6, 0], sizes = [1, 8], strides = [1, 1]} : vector<128x8xf32> to vector<1x8xf32>
    %c0_68 = arith.constant 0 : index
    %c352 = arith.constant 352 : index
    %146 = vector.load %arg5[%c0_68, %c352] : memref<1x456xf32, #tpu.memory_space<vmem>>, vector<1x8xf32>
    tpu.vector_store %arg5[%c0_68, %c352], %145 {strides = array<i32>} : memref<1x456xf32, #tpu.memory_space<vmem>>, vector<1x8xf32>,
    %147 = vector.extract_strided_slice %132 {offsets = [7, 0], sizes = [1, 8], strides = [1, 1]} : vector<128x8xf32> to vector<1x8xf32>
    %c0_69 = arith.constant 0 : index
    %c360 = arith.constant 360 : index
    %148 = vector.load %arg5[%c0_69, %c360] : memref<1x456xf32, #tpu.memory_space<vmem>>, vector<1x8xf32>
    tpu.vector_store %arg5[%c0_69, %c360], %147 {strides = array<i32>} : memref<1x456xf32, #tpu.memory_space<vmem>>, vector<1x8xf32>,
    %149 = vector.extract_strided_slice %132 {offsets = [8, 0], sizes = [1, 8], strides = [1, 1]} : vector<128x8xf32> to vector<1x8xf32>
    %c0_70 = arith.constant 0 : index
    %c368 = arith.constant 368 : index
    %150 = vector.load %arg5[%c0_70, %c368] : memref<1x456xf32, #tpu.memory_space<vmem>>, vector<1x8xf32>
    tpu.vector_store %arg5[%c0_70, %c368], %149 {strides = array<i32>} : memref<1x456xf32, #tpu.memory_space<vmem>>, vector<1x8xf32>,
    %151 = vector.extract_strided_slice %132 {offsets = [9, 0], sizes = [1, 8], strides = [1, 1]} : vector<128x8xf32> to vector<1x8xf32>
    %c0_71 = arith.constant 0 : index
    %c376 = arith.constant 376 : index
    %152 = vector.load %arg5[%c0_71, %c376] : memref<1x456xf32, #tpu.memory_space<vmem>>, vector<1x8xf32>
    tpu.vector_store %arg5[%c0_71, %c376], %151 {strides = array<i32>} : memref<1x456xf32, #tpu.memory_space<vmem>>, vector<1x8xf32>,
    %153 = vector.extract_strided_slice %132 {offsets = [10, 0], sizes = [1, 8], strides = [1, 1]} : vector<128x8xf32> to vector<1x8xf32>
    %c0_72 = arith.constant 0 : index
    %c384 = arith.constant 384 : index
    %154 = vector.load %arg5[%c0_72, %c384] : memref<1x456xf32, #tpu.memory_space<vmem>>, vector<1x8xf32>
    tpu.vector_store %arg5[%c0_72, %c384], %153 {strides = array<i32>} : memref<1x456xf32, #tpu.memory_space<vmem>>, vector<1x8xf32>,
    %155 = vector.extract_strided_slice %132 {offsets = [11, 0], sizes = [1, 8], strides = [1, 1]} : vector<128x8xf32> to vector<1x8xf32>
    %c0_73 = arith.constant 0 : index
    %c392 = arith.constant 392 : index
    %156 = vector.load %arg5[%c0_73, %c392] : memref<1x456xf32, #tpu.memory_space<vmem>>, vector<1x8xf32>
    tpu.vector_store %arg5[%c0_73, %c392], %155 {strides = array<i32>} : memref<1x456xf32, #tpu.memory_space<vmem>>, vector<1x8xf32>,
    %157 = vector.extract_strided_slice %132 {offsets = [12, 0], sizes = [1, 8], strides = [1, 1]} : vector<128x8xf32> to vector<1x8xf32>
    %c0_74 = arith.constant 0 : index
    %c400 = arith.constant 400 : index
    %158 = vector.load %arg5[%c0_74, %c400] : memref<1x456xf32, #tpu.memory_space<vmem>>, vector<1x8xf32>
    tpu.vector_store %arg5[%c0_74, %c400], %157 {strides = array<i32>} : memref<1x456xf32, #tpu.memory_space<vmem>>, vector<1x8xf32>,
    %159 = vector.extract_strided_slice %132 {offsets = [13, 0], sizes = [1, 8], strides = [1, 1]} : vector<128x8xf32> to vector<1x8xf32>
    %c0_75 = arith.constant 0 : index
    %c408 = arith.constant 408 : index
    %160 = vector.load %arg5[%c0_75, %c408] : memref<1x456xf32, #tpu.memory_space<vmem>>, vector<1x8xf32>
    tpu.vector_store %arg5[%c0_75, %c408], %159 {strides = array<i32>} : memref<1x456xf32, #tpu.memory_space<vmem>>, vector<1x8xf32>,
    %161 = vector.extract_strided_slice %132 {offsets = [14, 0], sizes = [1, 8], strides = [1, 1]} : vector<128x8xf32> to vector<1x8xf32>
    %c0_76 = arith.constant 0 : index
    %c416 = arith.constant 416 : index
    %162 = vector.load %arg5[%c0_76, %c416] : memref<1x456xf32, #tpu.memory_space<vmem>>, vector<1x8xf32>
    tpu.vector_store %arg5[%c0_76, %c416], %161 {strides = array<i32>} : memref<1x456xf32, #tpu.memory_space<vmem>>, vector<1x8xf32>,
    %163 = vector.extract_strided_slice %132 {offsets = [15, 0], sizes = [1, 8], strides = [1, 1]} : vector<128x8xf32> to vector<1x8xf32>
    %c0_77 = arith.constant 0 : index
    %c424 = arith.constant 424 : index
    %164 = vector.load %arg5[%c0_77, %c424] : memref<1x456xf32, #tpu.memory_space<vmem>>, vector<1x8xf32>
    tpu.vector_store %arg5[%c0_77, %c424], %163 {strides = array<i32>} : memref<1x456xf32, #tpu.memory_space<vmem>>, vector<1x8xf32>,
    %165 = vector.extract_strided_slice %132 {offsets = [16, 0], sizes = [1, 8], strides = [1, 1]} : vector<128x8xf32> to vector<1x8xf32>
    %c0_78 = arith.constant 0 : index
    %c432 = arith.constant 432 : index
    %166 = vector.load %arg5[%c0_78, %c432] : memref<1x456xf32, #tpu.memory_space<vmem>>, vector<1x8xf32>
    tpu.vector_store %arg5[%c0_78, %c432], %165 {strides = array<i32>} : memref<1x456xf32, #tpu.memory_space<vmem>>, vector<1x8xf32>,
    %167 = vector.extract_strided_slice %132 {offsets = [17, 0], sizes = [1, 8], strides = [1, 1]} : vector<128x8xf32> to vector<1x8xf32>
    %c0_79 = arith.constant 0 : index
    %c440 = arith.constant 440 : index
    %168 = vector.load %arg5[%c0_79, %c440] : memref<1x456xf32, #tpu.memory_space<vmem>>, vector<1x8xf32>
    tpu.vector_store %arg5[%c0_79, %c440], %167 {strides = array<i32>} : memref<1x456xf32, #tpu.memory_space<vmem>>, vector<1x8xf32>,
    %169 = vector.extract_strided_slice %132 {offsets = [18, 0], sizes = [1, 8], strides = [1, 1]} : vector<128x8xf32> to vector<1x8xf32>
    %c0_80 = arith.constant 0 : index
    %c448 = arith.constant 448 : index
    %170 = vector.load %arg5[%c0_80, %c448] : memref<1x456xf32, #tpu.memory_space<vmem>>, vector<1x8xf32>
    tpu.vector_store %arg5[%c0_80, %c448], %169 {strides = array<i32>} : memref<1x456xf32, #tpu.memory_space<vmem>>, vector<1x8xf32>,
    %c0_81 = arith.constant 0 : index
    %c0_82 = arith.constant 0 : index
    %171 = vector.load %arg5[%c0_81, %c0_82] : memref<1x456xf32, #tpu.memory_space<vmem>>, vector<1x57xf32>
    %c0_83 = arith.constant 0 : index
    %c57 = arith.constant 57 : index
    %172 = vector.load %arg5[%c0_83, %c57] : memref<1x456xf32, #tpu.memory_space<vmem>>, vector<1x57xf32>
    %c0_84 = arith.constant 0 : index
    %c114 = arith.constant 114 : index
    %173 = vector.load %arg5[%c0_84, %c114] : memref<1x456xf32, #tpu.memory_space<vmem>>, vector<1x57xf32>
    %c0_85 = arith.constant 0 : index
    %c171 = arith.constant 171 : index
    %174 = vector.load %arg5[%c0_85, %c171] : memref<1x456xf32, #tpu.memory_space<vmem>>, vector<1x57xf32>
    %c0_86 = arith.constant 0 : index
    %c228 = arith.constant 228 : index
    %175 = vector.load %arg5[%c0_86, %c228] : memref<1x456xf32, #tpu.memory_space<vmem>>, vector<1x57xf32>
    %c0_87 = arith.constant 0 : index
    %c285 = arith.constant 285 : index
    %176 = vector.load %arg5[%c0_87, %c285] : memref<1x456xf32, #tpu.memory_space<vmem>>, vector<1x57xf32>
    %c0_88 = arith.constant 0 : index
    %c342 = arith.constant 342 : index
    %177 = vector.load %arg5[%c0_88, %c342] : memref<1x456xf32, #tpu.memory_space<vmem>>, vector<1x57xf32>
    %c0_89 = arith.constant 0 : index
    %c399 = arith.constant 399 : index
    %178 = vector.load %arg5[%c0_89, %c399] : memref<1x456xf32, #tpu.memory_space<vmem>>, vector<1x57xf32>
    %179 = tpu.concatenate %171, %172, %173, %174, %175, %176, %177, %178 in 0 : vector<1x57xf32>, vector<1x57xf32>, vector<1x57xf32>, vector<1x57xf32>, vector<1x57xf32>, vector<1x57xf32>, vector<1x57xf32>, vector<1x57xf32> -> vector<8x57xf32>
    %c0_90 = arith.constant 0 : index
    %c0_91 = arith.constant 0 : index
    %180 = vector.load %arg3[%c0_90, %c0_91] : memref<58x16xf32, #tpu.memory_space<vmem>>, vector<57x16xf32>
    %c57_92 = arith.constant 57 : index
    %c0_93 = arith.constant 0 : index
    %181 = vector.load %arg3[%c57_92, %c0_93] : memref<58x16xf32, #tpu.memory_space<vmem>>, vector<1x16xf32>
    %cst_94 = arith.constant dense<0.000000e+00> : vector<8x16xf32>
    %182 = tpu.matmul %179, %180, %cst_94 {dimension_numbers = #tpu.dot_dimension_numbers<[1], [0], [0], [1], [0, 0, 1, 1], [], []>} : vector<8x57xf32>, vector<57x16xf32>, vector<8x16xf32> -> vector<8x16xf32>
    %183 = vector.broadcast %181 : vector<1x16xf32> to vector<8x16xf32>
    %184 = arith.addf %182, %183 : vector<8x16xf32>
    %c0_95 = arith.constant 0 : index
    %c0_96 = arith.constant 0 : index
    %185 = vector.load %arg4[%c0_95, %c0_96] : memref<8x16xf32, #tpu.memory_space<vmem>>, vector<8x16xf32>
    tpu.vector_store %arg4[%c0_95, %c0_96], %184 {strides = array<i32>} : memref<8x16xf32, #tpu.memory_space<vmem>>, vector<8x16xf32>,
    return
  }
}

</mosaic_0001>

<bundles_post_ra>
// kernel: tpu_custom_call.1
= control target key start
LH: loop header
LB: loop body
LE: loop exit
PB: predicated region body
PF: predicated region fallthrough
CT: control target
= control target key end

     0   :  { %9 = vsyncpa [#allocation4], 0  ;;  %s2128_s0 = inlined_call_operand.vmem [shape: f32[8,16], index: 0, kind: input, shape index: {}]   ;;  %s2129_s1 = inlined_call_operand.vmem [shape: f32[8,8], index: 1, kind: input, shape index: {}]   ;;  %s2130_s2 = inlined_call_operand.hbm [shape: f32[17,1152], index: 2, kind: input, shape index: {}]   ;;  %s2131_s3 = inlined_call_operand.vmem [shape: f32[58,16], index: 3, kind: input, shape index: {}]   ;;  %s2132_s4 = inlined_call_operand.hbm [shape: f32[8,16], index: 4, kind: output, shape index: {}]  }
   0x1   :  { %10 = vsyncpa [#allocation5], 0  ;;  %s19_s17 = sshll.u32 %s2130_s2, 4  ;;  %s1513_s18 = smov [#allocation3]   ;;  %s20_s17 = int_to_ptr.hbm [resolvable:$true] %s19_s17 }
   0x2   :  { %s21_s19 = sshll.u32 %s1513_s18, 4  ;;  %s1514_s20 = smov 1152   ;;  %s22_s19 = int_to_ptr.vmem [resolvable:$true] %s21_s19 }
   0x3   :  { %s1515_s21 = smov 72  }
   0x4   :  { %27 = dma.hbm_to_vmem [thread:$0]  %s20_s17, 3456, %s22_s19, [#allocation4], %s1514_s20, %s1514_s20, %s1515_s21  }
   0x5   :  { %1509 = dma.done.wait [#allocation4], 3456  }
   0x6   :  { %1510 = vsyncadd [#allocation4], 4294963840  ;;  %v49_v0 = vld [vmem:[#allocation3 + $0x60] sm:$0xff]  ;;  %v40_v1 = vld [vmem:[#allocation3 + $0x18] sm:$0xff]  ;;  %vm2133_vm0 = vcmask 130048   ;;  %vm285_vm1 = vcmask 64512  }
   0x7   :  { %v46_v2 = vld [vmem:[#allocation3 + $0x48] sm:$0xff]  ;;  %159 = vmatpush.msra.mxu3 %v49_v0  ;;  %v1570_v3 = vld [vmem:[%s2128_s0] sm:$0xff]  ;;  %v37_v4 = vld [vmem:[#allocation3] sm:$0xff]  ;;  %s1517_s24 = smov 16   ;;  %s1518_s25 = smov 24  }
   0x8   :  { %99 = vmatpush.msra.mxu1 %v46_v2  ;;  %v50_v5 = vld [vmem:[#allocation3 + $0x68] sm:$0xff]  ;;  %v41_v6 = vld [vmem:[#allocation3 + $0x20] sm:$0xff]  ;;  %v47_v7 = vld [vmem:[#allocation3 + $0x50] sm:$0xff]  ;;  %s1519_s26 = smov 40   ;;  %s1520_s27 = smov 48  }
   0x9   :  { %179 = vmatpush.msra.mxu0 %v50_v5  ;;  %160 = vmatpush.msra.mxu3 %v40_v1  ;;  %v53_v8 = vld [vmem:[#allocation3 + $0x80] sm:$0xff]  ;;  %v38_v9 = vld [vmem:[#allocation3 + $0x8] sm:$0xff]  ;;  %v44_v10 = vld [vmem:[#allocation3 + $0x38] sm:$0xff]  ;;  %s1521_s28 = smov 32   ;;  %s1522_s29 = smov 56  }
   0xa   :  { %100 = vmatpush.msra.mxu1 %v37_v4  ;;  %1355 = vmatmul.msk.f32.vlgmr.msra.gmra.mxu3 %vm2133_vm0, %v1570_v3  ;;  %v48_v11 = vld [vmem:[#allocation3 + $0x58] sm:$0xff]  ;;  %v39_v12 = vld [vmem:[#allocation3 + $0x10] sm:$0xff]  ;;  %v42_v14 = vld [vmem:[#allocation3 + $0x28] sm:$0xff]  ;;  %s1523_s30 = smov 64   ;;  %s1524_s5 = smov 80  }
   0xb   :  { %1352 = vmatmul.msk.f32.vlgmr.msra.gmra.mxu1 %vm2133_vm0, %v1570_v3  ;;  %180 = vmatpush.msra.mxu0 %v41_v6  ;;  %v51_v13 = vld [vmem:[#allocation3 + $0x70] sm:$0xff]  ;;  %v52_v15 = vld [vmem:[#allocation3 + $0x78] sm:$0xff]  ;;  %v54_v4 = vld [vmem:[#allocation3 + $0x88] sm:$0xff]  ;;  %s1525_s6 = smov 88   ;;  %s1526_s7 = smov 96  }
   0xc   :  { %119 = vmatpush.msrb.mxu1 %v47_v7  ;;  %1356 = vmatmul.msk.f32.vlgmr.msra.gmra.mxu0 %vm2133_vm0, %v1570_v3  ;;  %v43_v16 = vld [vmem:[#allocation3 + $0x30] sm:$0xff]  ;;  %v45_v6 = vld [vmem:[#allocation3 + $0x40] sm:$0xff]  ;;  %s1527_s8 = smov 104   ;;  %s1528_s9 = smov 112  }
   0xd   :  { %239 = vmatpush.msrb.mxu3 %v53_v8  ;;  %219 = vmatpush.msra.mxu2 %v52_v15  ;;  %v56_v17 = vld [vmem:[#allocation3 + $0x90] ss:$8 sm:$0xf]  ;;  %s1529_s10 = smov 120   ;;  %s1530_s11 = smov 71  }
   0xe   :  { %120 = vmatpush.msrb.mxu1 %v38_v9  ;;  %v57_v18 = vld [vmem:[#allocation3 + $0x90] ss:$8 sm:$0xf0]  ;;  %259 = vmatpush.msrb.mxu0 %v54_v4  ;;  %s1531_s12 = smov 14   ;;  %s1532_s13 = smov 85  }
   0xf   :  { %240 = vmatpush.msrb.mxu3 %v44_v10  ;;  %220 = vmatpush.msra.mxu2 %v43_v16  ;;  %v1588_v19 = vor.u32 %v57_v18, %v56_v17  ;;  %v1635_v18 = vld [vmem:[%s2129_s1] sm:$0xff]  ;;  %s1516_s1 = smov 8   ;;  %s1533_s14 = smov 99  }
  0x10   :  { %139 = vmatpush.msra.mxu1 %v48_v11  ;;  %1358 = vmatmul.msk.f32.vlgmr.msra.gmra.mxu2 %vm2133_vm0, %v1570_v3  ;;  %vm36_vm6 = vcmp.gt.f32.partialorder %v1635_v18, 0.0  ;;  %s1534_s15 = smov 28   ;;  %s1535_s16 = smov 113  }
  0x11   :  { %v67_v20 = vperm.slane %v1588_v19, 4  ;;  %v66_v23 = vperm.slane %v1588_v19, 3  ;;  %v63_v25 = vperm.slane %v1588_v19, 0  ;;  %v64_v26 = vperm.slane %v1588_v19, 1  ;;  %260 = vmatpush.msrb.mxu0 %v45_v6  ;;  %s1536_s17 = smov 42  }
  0x12   :  { %140 = vmatpush.msra.mxu1 %v39_v12  ;;  %1359 = vmatmul.msk.f32.vlgmr.msrb.gmra.mxu3 %vm2133_vm0, %v1570_v3  ;;  %v70_v32 = vperm.slane %v1588_v19, 7  ;;  %v69_v38 = vperm.slane %v1588_v19, 6 }
  0x13   :  { %1353 = vmatmul.msk.f32.vlgmr.msrb.gmra.mxu1 %vm2133_vm0, %v1570_v3 }
  0x14   :  { %199 = vmatpush.msrb.mxu1 %v51_v13  ;;  %1360 = vmatmul.msk.f32.vlgmr.msrb.gmra.mxu0 %vm2133_vm0, %v1570_v3 }
  0x16   :  { %200 = vmatpush.msrb.mxu1 %v42_v14 }
  0x1b   :  { %1354 = vmatmul.msk.f32.vlgmr.msra.gmra.mxu1 %vm2133_vm0, %v1570_v3 }
  0x23   :  { %1357 = vmatmul.msk.f32.vlgmr.msrb.gmra.mxu1 %vm2133_vm0, %v1570_v3 }
  0x88   :  { %v102_v21 = vpop.f32.mrf.mxu1 }
  0x89   :  { %v182_v22 = vpop.f32.mrf.mxu0  ;;  %v103_v29 = vadd.f32 %v102_v21, %v63_v25 }
  0x8a   :  { %v183_v24 = vadd.f32 %v182_v22, %v67_v20 }
  0x8c   :  { %631 = vmatpush.xpose.msra.mxu3 %v183_v24 }
  0x8d   :  { %v162_v27 = vpop.f32.mrf.mxu3 }
  0x8e   :  { %v163_v28 = vadd.f32 %v162_v27, %v66_v23 }
  0x90   :  { %v122_v30 = vpop.f32.mrf.mxu1  ;;  %280 = vmatpush.xpose.msra.mxu1 %v163_v28 }
  0x91   :  { %v123_v31 = vadd.f32 %v122_v30, %v64_v26 }
  0x93   :  { %632 = vmatmul.f32.vlgmr.msra.gmra.mxu3 %v123_v31  ;;  %281 = vmatmul.f32.vlgmr.msra.gmra.mxu1 %v103_v29  ;;  %v222_v40 = vpop.f32.mrf.mxu2 }
  0x94   :  { %v223_v41 = vadd.f32 %v222_v40, %v69_v38 }
  0x95   :  { %v242_v33 = vpop.f32.mrf.mxu3 }
  0x96   :  { %v243_v34 = vadd.f32 %v242_v33, %v70_v32  ;;  %v68_v33 = vperm.slane %v1588_v19, 5 }
  0x98   :  { %661 = vxpose.xlu2.b32.start.end [1/1] (short) %v243_v34, 128  ;;  %v1595_v35 = vpop.f32.mrf.mxu1 }
  0xa0   :  { %v1597_v36 = vpop.f32.mrf.mxu1 }
 0x110   :  { %v282_v37 = vpop.f32.mrf.mxu1 }
 0x111   :  { %v286_v39 = vsel %vm285_vm1, %v282_v37, -inf }
 0x112   :  { %287 = vmax.xlane.f32.xlu0 %v286_v39  ;;  %v203_v39 = vadd.f32 %v1597_v36, %v68_v33  ;;  %v65_v36 = vperm.slane %v1588_v19, 2 }
 0x116   :  { %v633_v42 = vpop.f32.mrf.mxu3 }
 0x117   :  { %v636_v43 = vsel %vm285_vm1, %v633_v42, -inf }
 0x118   :  { %311 = vxpose.xlu2.b32.start.end [1/1] (short) %v223_v41, 128 }
 0x11a   :  { %637 = vmax.xlane.f32.xlu0 %v636_v43 }
 0x131   :  { %v1602_v44 = vpop.trf.xlu2 }
 0x139   :  { %v1604_v45 = vpop.trf.xlu2 }
 0x141   :  { %v1606_v49 = vpop.trf.xlu2 }
 0x149   :  { %v1609_v55 = vpop.trf.xlu2 }
 0x151   :  { %v1612_v58 = vpop.trf.xlu2 }
 0x159   :  { %v1614_v59 = vpop.trf.xlu2 }
 0x161   :  { %v1616_v60 = vpop.trf.xlu2 }
 0x169   :  { %v1618_v61 = vpop.trf.xlu2 }
 0x171   :  { %v1620_v62 = vpop.trf.xlu2 }
 0x179   :  { %v1622_v63 = vpop.trf.xlu2 }
 0x181   :  { %v1624_v0 = vpop.trf.xlu2 }
 0x185   :  { %v288_v46 = vpop.xlane.xlu0 %287 }
 0x186   :  { %v289_v47 = vsub.f32 %v282_v37, %v288_v46  ;;  %v1685_v46 = vpop.f32.mrf.mxu0 }
 0x188   :  { %v290_v48 = vmul.f32 1.442695, %v289_v47  ;;  %v2145_v47 = vmov 0 }
 0x189   :  { %v1626_v1 = vpop.trf.xlu2 }
 0x18a   :  { %1449 = vpow2.f32 %v290_v48 }
 0x18d   :  { %v638_v50 = vpop.xlane.xlu0 %637 }
 0x18e   :  { %v639_v51 = vsub.f32 %v633_v42, %v638_v50  ;;  %v143_v42 = vadd.f32 %v1595_v35, %v65_v36  ;;  %v2149_v36 = vmov 0 }
 0x190   :  { %v1450_v52 = vpop.eup %1449  ;;  %v640_v53 = vmul.f32 1.442695, %v639_v51 }
 0x191   :  { %v292_v54 = vsel %vm285_vm1, %v1450_v52, 0.0  ;;  %v1628_v2 = vpop.trf.xlu2 }
 0x192   :  { %1451 = vpow2.f32 %v640_v53  ;;  %293 = vadd.xlane.f32.xlu1 %v292_v54 }
 0x198   :  { %v1452_v56 = vpop.eup %1451 }
 0x199   :  { %v642_v57 = vsel %vm285_vm1, %v1452_v56, 0.0  ;;  %v690_v5 = vpop.trf.xlu2 }
 0x19a   :  { %643 = vadd.xlane.f32.xlu1 %v642_v57 }
 0x1a1   :  { %v691_v7 = vpop.trf.xlu2 }
 0x1a9   :  { %v692_v12 = vpop.trf.xlu2 }
 0x1b1   :  { %v327_v27 = vpop.trf.xlu2 }
 0x1b9   :  { %v328_v41 = vpop.trf.xlu2 }
 0x1c1   :  { %v329_v43 = vpop.trf.xlu2 }
 0x1c9   :  { %v330_v19 = vpop.trf.xlu2 }
 0x1d1   :  { %v331_v35 = vpop.trf.xlu2 }
 0x205   :  { %v294_v8 = vpop.xlane.xlu1 %293 }
 0x206   :  { %1453 = vrcp.f32 %v294_v8  ;;  %v306_v14 = vand.u32 2147483648, %v294_v8  ;;  %v304_v16 = vand.u32 2147483647, %v294_v8  ;;  %vm300_vm3 = vweird.f32 %v294_v8 }
 0x208   :  { %v307_v20 = vor.u32 1.1754944e-38, %v306_v14  ;;  %vm305_vm5 = vcmp.eq.f32.partialorder %v304_v16, 8.507059e+37 }
 0x20c   :  { %v1454_v9 = vpop.eup %1453 }
 0x20d   :  { %v296_v10 = vmul.f32 %v1454_v9, %v294_v8  ;;  %v644_v11 = vpop.xlane.xlu1 %643  ;;  %vm301_vm2 = vweird.f32 %v1454_v9 }
 0x20e   :  { %1455 = vrcp.f32 %v644_v11  ;;  %vm302_vm4 = vmor %vm300_vm3, %vm301_vm2  ;;  %v656_v26 = vand.u32 2147483648, %v644_v11  ;;  %v654_v29 = vand.u32 2147483647, %v644_v11  ;;  %vm650_vm8 = vweird.f32 %v644_v11 }
 0x20f   :  { %v297_v13 = vsub.f32 1.0, %v296_v10 }
 0x210   :  { %v657_v32 = vor.u32 1.1754944e-38, %v656_v26  ;;  %vm655_vm10 = vcmp.eq.f32.partialorder %v654_v29, 8.507059e+37 }
 0x211   :  { %v298_v15 = vmul.f32 %v1454_v9, %v297_v13 }
 0x213   :  { %v299_v17 = vadd.f32 %v1454_v9, %v298_v15 }
 0x214   :  { %v1456_v3 = vpop.eup %1455 }
 0x215   :  { %v646_v21 = vmul.f32 %v1456_v3, %v644_v11  ;;  %v303_v22 = vsel %vm302_vm4, %v1454_v9, %v299_v17  ;;  %vm651_vm7 = vweird.f32 %v1456_v3 }
 0x216   :  { %v308_v23 = vsel %vm305_vm5, %v307_v20, %v303_v22  ;;  %vm652_vm9 = vmor %vm650_vm8, %vm651_vm7  ;;  %v1443_v20 = vld [vmem:[#allocation3 + $0xd0] ss:$0 sm:$0xff] }
 0x217   :  { %v647_v24 = vsub.f32 1.0, %v646_v21  ;;  %v309_v25 = vmul.f32 %v1450_v52, %v308_v23  ;;  %v263_v22 = vadd.f32 %v1443_v20, %v1685_v46 }
 0x219   :  { %v648_v28 = vmul.f32 %v1456_v3, %v647_v24  ;;  %v310_v30 = vsel %vm36_vm6, %v309_v25, -9e+15 }
 0x21a   :  { %1361 = vmatpush.xpose.msk.msrb.mxu1 %vm285_vm1, %v310_v30  ;;  %1414 = vmatpush.xpose.msk.msrb.mxu2 %vm285_vm1, %v310_v30 }
 0x21b   :  { %v649_v31 = vadd.f32 %v1456_v3, %v648_v28 }
 0x21d   :  { %1362 = vmatmul.msk.f32.vlgmr.msrb.gmra.mxu1 %vm285_vm1, %v327_v27  ;;  %v653_v34 = vsel %vm652_vm9, %v1456_v3, %v649_v31  ;;  %1364 = vmatmul.msk.f32.vlgmr.msrb.gmra.mxu2 %vm285_vm1, %v329_v43 }
 0x21e   :  { %v658_v37 = vsel %vm655_vm10, %v657_v32, %v653_v34 }
 0x21f   :  { %v659_v38 = vmul.f32 %v1452_v56, %v658_v37 }
 0x221   :  { %v660_v40 = vsel %vm36_vm6, %v659_v38, -9e+15 }
 0x222   :  { %1378 = vmatpush.xpose.msk.msra.mxu0 %vm285_vm1, %v660_v40  ;;  %1415 = vmatpush.xpose.msk.msra.mxu1 %vm285_vm1, %v660_v40 }
 0x225   :  { %1363 = vmatmul.msk.f32.gmra.mxu1 %vm285_vm1, %v328_v41  ;;  %1379 = vmatmul.msk.f32.vlgmr.msra.gmra.mxu0 %vm285_vm1, %v1602_v44  ;;  %v332_v44 = vpop.trf.xlu2 }
 0x226   :  { %936 = vmatpush.xpose.msrb.mxu1 %v203_v39  ;;  %1365 = vmatmul.msk.f32.gmra.mxu2 %vm285_vm1, %v330_v19 }
 0x22d   :  { %1380 = vmatmul.msk.f32.gmra.mxu0 %vm285_vm1, %v1604_v45  ;;  %1392 = vmatmul.msk.f32.vlgmr.msra.gmra.mxu1 %vm285_vm1, %v690_v5  ;;  %v446_v45 = vlaneseq }
 0x22e   :  { %1366 = vmatmul.msk.f32.gmra.mxu2 %vm285_vm1, %v331_v35  ;;  %v2151_v35 = vmov 0 }
 0x22f   :  { %vm1688_vm11 = vcmp.lt.s32.totalorder %v446_v45, 8  ;;  %vm458_vm12 = vcmp.ge.s32.totalorder %v446_v45, 8  ;;  %vm459_vm13 = vcmp.lt.s32.totalorder %v446_v45, 16  ;;  %vm468_vm15 = vcmp.ge.s32.totalorder %v446_v45, 16 }
 0x230   :  { %v2146_v47 = vsel %vm1688_vm11, 4294967295, %v2145_v47  ;;  %vm1753_vm14 = vmand %vm458_vm12, %vm459_vm13  ;;  %vm469_vm2 = vcmp.lt.s32.totalorder %v446_v45, 24  ;;  %vm478_vm4 = vcmp.ge.s32.totalorder %v446_v45, 24  ;;  %vm479_vm5 = vcmp.lt.s32.totalorder %v446_v45, 32 }
 0x231   :  { %vm1762_vm3 = vmand %vm468_vm15, %vm469_vm2  ;;  %vm489_vm13 = vcmp.lt.s32.totalorder %v446_v45, 40  ;;  %vm498_vm2 = vcmp.ge.s32.totalorder %v446_v45, 40 }
 0x232   :  { %v2150_v36 = vsel %vm1762_vm3, 4294967295, %v2149_v36  ;;  %vm1771_vm7 = vmand %vm478_vm4, %vm479_vm5  ;;  %vm499_vm4 = vcmp.lt.s32.totalorder %v446_v45, 48 }
 0x233   :  { %v2152_v35 = vsel %vm1771_vm7, 4294967295, %v2151_v35  ;;  %vm1887_vm5 = vmand %vm498_vm2, %vm499_vm4  ;;  %vm526_vm2 = vcmp.ge.s32.totalorder %v446_v45, 64  ;;  %vm527_vm4 = vcmp.lt.s32.totalorder %v446_v45, 72 }
 0x235   :  { %1381 = vmatmul.msk.f32.gmra.mxu0 %vm285_vm1, %v1606_v49  ;;  %1393 = vmatmul.msk.f32.gmra.mxu1 %vm285_vm1, %v691_v7  ;;  %v333_v49 = vpop.trf.xlu2 }
 0x236   :  { %1367 = vmatmul.msk.f32.gmra.mxu2 %vm285_vm1, %v332_v44 }
 0x23d   :  { %1382 = vmatmul.msk.f32.gmra.mxu0 %vm285_vm1, %v1609_v55  ;;  %1394 = vmatmul.msk.f32.gmra.mxu1 %vm285_vm1, %v692_v12  ;;  %v334_v53 = vpop.trf.xlu2 }
 0x23e   :  { %1368 = vmatmul.msk.f32.gmra.mxu2 %vm285_vm1, %v333_v49 }
 0x245   :  { %1383 = vmatmul.msk.f32.gmra.mxu0 %vm285_vm1, %v1612_v58  ;;  %937 = vmatmul.f32.vlgmr.msrb.gmra.mxu1 %v143_v42  ;;  %v335_v57 = vpop.trf.xlu2 }
 0x246   :  { %1369 = vmatmul.msk.f32.gmra.mxu2 %vm285_vm1, %v334_v53 }
 0x24d   :  { %1384 = vmatmul.msk.f32.gmra.mxu0 %vm285_vm1, %v1614_v59 }
 0x24e   :  { %1370 = vmatmul.msk.f32.gmra.mxu2 %vm285_vm1, %v335_v57 }
 0x255   :  { %1385 = vmatmul.msk.f32.gmra.mxu0 %vm285_vm1, %v1616_v60 }
 0x25d   :  { %1386 = vmatmul.msk.f32.gmra.mxu0 %vm285_vm1, %v1618_v61  ;;  %v336_v61 = vpop.trf.xlu2 }
 0x25e   :  { %1371 = vmatmul.msk.f32.gmra.mxu2 %vm285_vm1, %v336_v61 }
 0x265   :  { %1387 = vmatmul.msk.f32.gmra.mxu0 %vm285_vm1, %v1620_v62 }
 0x26d   :  { %1388 = vmatmul.msk.f32.gmra.mxu0 %vm285_vm1, %v1622_v63 }
 0x275   :  { %1389 = vmatmul.msk.f32.gmra.mxu0 %vm285_vm1, %v1624_v0 }
 0x27d   :  { %1390 = vmatmul.msk.f32.gmra.mxu0 %vm285_vm1, %v1626_v1  ;;  %v337_v1 = vpop.trf.xlu2 }
 0x27e   :  { %1372 = vmatmul.msk.f32.gmra.mxu2 %vm285_vm1, %v337_v1 }
 0x285   :  { %1391 = vmatmul.msk.f32.gmra.mxu0 %vm285_vm1, %v1628_v2  ;;  %v338_v7 = vpop.trf.xlu2 }
 0x286   :  { %1373 = vmatmul.msk.f32.gmra.mxu2 %vm285_vm1, %v338_v7 }
 0x28d   :  { %v339_v10 = vpop.trf.xlu2 }
 0x28e   :  { %1374 = vmatmul.msk.f32.gmra.mxu2 %vm285_vm1, %v339_v10 }
 0x295   :  { %v340_v13 = vpop.trf.xlu2 }
 0x296   :  { %1375 = vmatmul.msk.f32.gmra.mxu2 %vm285_vm1, %v340_v13 }
 0x29a   :  { %v411_v48 = vpop.f32.mrf.mxu1 }
 0x29b   :  { %452 = vst [vmem:[#allocation1] sm:$0xff] %v411_v48 }
 0x29c   :  { %450 = vst.msk [vmem:[#allocation2] sm:$0x1] %vm1688_vm11, %v411_v48 }
 0x29d   :  { %v341_v16 = vpop.trf.xlu2 }
 0x29e   :  { %1376 = vmatmul.msk.f32.gmra.mxu2 %vm285_vm1, %v341_v16 }
 0x2a0   :  { %v417_v25 = vpop.f32.mrf.mxu2 }
 0x2a1   :  { %600 = vst.msk [vmem:[#allocation2 + $0x1] sm:$0x1] %vm1688_vm11, %v417_v25 }
 0x2a2   :  { %v454_v50 = vld [vmem:[#allocation1 + $0x1] ss:$9 sm:$0xff]  ;;  %v1695_v51 = vpop.f32.mrf.mxu1  ;;  %v1697_v52 = vpop.f32.mrf.mxu0 }
 0x2a3   :  { %462 = vst [vmem:[#allocation1] sm:$0xff] %v411_v48  ;;  %455 = vrot.lane.b32.xlu1 %v454_v50, %s1516_s1 }
 0x2a5   :  { %v342_v21 = vpop.trf.xlu2 }
 0x2a6   :  { %1377 = vmatmul.msk.f32.gmra.mxu2 %vm285_vm1, %v342_v21 }
 0x2a9   :  { %v420_v32 = vpop.f32.mrf.mxu2 }
 0x2aa   :  { %v464_v54 = vld [vmem:[#allocation1 + $0x2] ss:$9 sm:$0xff]  ;;  %v1701_v55 = vpop.f32.mrf.mxu0  ;;  %v790_v56 = vpop.f32.mrf.mxu1 }
 0x2ab   :  { %472 = vst [vmem:[#allocation1] sm:$0xff] %v411_v48  ;;  %465 = vrot.lane.b32.xlu1 %v464_v54, %s1517_s24 }
 0x2b1   :  { %v422_v34 = vpop.f32.mrf.mxu2 }
 0x2b2   :  { %v474_v58 = vld [vmem:[#allocation1 + $0x3] ss:$9 sm:$0xff]  ;;  %v1705_v59 = vpop.f32.mrf.mxu0  ;;  %v792_v60 = vpop.f32.mrf.mxu1 }
 0x2b3   :  { %482 = vst [vmem:[#allocation1] sm:$0xff] %v411_v48  ;;  %475 = vrot.lane.b32.xlu1 %v474_v58, %s1518_s25  ;;  %903 = vrot.lane.b32.xlu2 %v1705_v59, %s1518_s25 }
 0x2b9   :  { %v424_v40 = vpop.f32.mrf.mxu2 }
 0x2ba   :  { %v1711_v62 = vld [vmem:[#allocation1 + $0x4] ss:$9 sm:$0xff]  ;;  %v770_v63 = vpop.f32.mrf.mxu0  ;;  %v794_v0 = vpop.f32.mrf.mxu1 }
 0x2bb   :  { %492 = vst [vmem:[#allocation1] sm:$0xff] %v411_v48 }
 0x2c1   :  { %v426_v43 = vpop.f32.mrf.mxu2 }
 0x2c2   :  { %v494_v2 = vld [vmem:[#allocation1 + $0x5] ss:$9 sm:$0xff]  ;;  %v772_v4 = vpop.f32.mrf.mxu0  ;;  %v1714_v5 = vpop.f32.mrf.mxu1 }
 0x2c3   :  { %502 = vst [vmem:[#allocation1] sm:$0xff] %v411_v48  ;;  %495 = vrot.lane.b32.xlu1 %v494_v2, %s1519_s26  ;;  %v941_v6 = vsel %vm285_vm1, %v1714_v5, -inf }
 0x2c4   :  { %942 = vmax.xlane.f32.xlu0 %v941_v6 }
 0x2c9   :  { %v428_v46 = vpop.f32.mrf.mxu2 }
 0x2ca   :  { %v504_v8 = vld [vmem:[#allocation1 + $0x6] ss:$9 sm:$0xff]  ;;  %v774_v9 = vpop.f32.mrf.mxu0 }
 0x2cb   :  { %512 = vst [vmem:[#allocation1] sm:$0xff] %v411_v48  ;;  %505 = vrot.lane.b32.xlu1 %v504_v8, %s1520_s27 }
 0x2d1   :  { %v430_v49 = vpop.f32.mrf.mxu2 }
 0x2d2   :  { %v1722_v11 = vld [vmem:[#allocation1 + $0x7] ss:$9 sm:$0xff]  ;;  %v776_v12 = vpop.f32.mrf.mxu0 }
 0x2d3   :  { %530 = vst [vmem:[#allocation1] sm:$0xff] %v1695_v51 }
 0x2da   :  { %v1726_v14 = vld [vmem:[#allocation1 + $0x1] ss:$9 sm:$0xff]  ;;  %v778_v15 = vpop.f32.mrf.mxu0 }
 0x2db   :  { %540 = vst [vmem:[#allocation1] sm:$0xff] %v1695_v51 }
 0x2e1   :  { %v432_v56 = vpop.f32.mrf.mxu2 }
 0x2e2   :  { %v1730_v17 = vld [vmem:[#allocation1 + $0x2] ss:$9 sm:$0xff]  ;;  %v780_v3 = vpop.f32.mrf.mxu0 }
 0x2e3   :  { %550 = vst [vmem:[#allocation1] sm:$0xff] %v1695_v51 }
 0x2ea   :  { %v1735_v23 = vld [vmem:[#allocation1 + $0x3] ss:$9 sm:$0xff]  ;;  %v782_v24 = vpop.f32.mrf.mxu0 }
 0x2eb   :  { %560 = vst [vmem:[#allocation1] sm:$0xff] %v1695_v51 }
 0x2ed   :  { %966 = vxpose.xlu0.b32.start.end [1/1] (short) %v263_v22, 128 }
 0x2f2   :  { %v1740_v26 = vld [vmem:[#allocation1 + $0x4] ss:$9 sm:$0xff]  ;;  %v784_v27 = vpop.f32.mrf.mxu0 }
 0x2f3   :  { %570 = vst [vmem:[#allocation1] sm:$0xff] %v1695_v51 }
 0x2fa   :  { %v1743_v28 = vld [vmem:[#allocation1 + $0x5] ss:$9 sm:$0xff]  ;;  %v786_v29 = vpop.f32.mrf.mxu0 }
 0x2fb   :  { %580 = vst [vmem:[#allocation1] sm:$0xff] %v1695_v51 }
 0x301   :  { %v434_v60 = vpop.f32.mrf.mxu2 }
 0x302   :  { %v1746_v30 = vld [vmem:[#allocation1 + $0x6] ss:$9 sm:$0xff]  ;;  %v788_v31 = vpop.f32.mrf.mxu0 }
 0x303   :  { %590 = vst [vmem:[#allocation1] sm:$0xff] %v1695_v51 }
 0x309   :  { %v436_v1 = vpop.f32.mrf.mxu2 }
 0x30a   :  { %v1749_v33 = vld [vmem:[#allocation1 + $0x7] ss:$9 sm:$0xff] }
 0x30b   :  { %602 = vst [vmem:[#allocation1] sm:$0xff] %v417_v25 }
 0x311   :  { %v438_v4 = vpop.f32.mrf.mxu2 }
 0x312   :  { %v604_v37 = vld [vmem:[#allocation1 + $0x1] ss:$9 sm:$0xff] }
 0x313   :  { %609 = vst [vmem:[#allocation1] sm:$0xff] %v417_v25 }
 0x315   :  { %v456_v39 = vpop.permute.xlu1 %455 }
 0x316   :  { %461 = vst.msk [vmem:[#allocation2] sm:$0x1] %vm1753_vm14, %v456_v39 }
 0x319   :  { %v440_v6 = vpop.f32.mrf.mxu2 }
 0x31a   :  { %v611_v41 = vld [vmem:[#allocation1 + $0x2] ss:$9 sm:$0xff] }
 0x31b   :  { %801 = vst [vmem:[#allocation1] sm:$0xff] %v1697_v52 }
 0x31d   :  { %v466_v42 = vpop.permute.xlu1 %465 }
 0x31e   :  { %471 = vst.msk [vmem:[#allocation2] sm:$0x1] %vm1762_vm3, %v466_v42 }
 0x321   :  { %v442_v8 = vpop.f32.mrf.mxu2 }
 0x322   :  { %v803_v19 = vld [vmem:[#allocation1 + $0x1] ss:$9 sm:$0xff] }
 0x323   :  { %808 = vst [vmem:[#allocation1] sm:$0xff] %v1697_v52 }
 0x325   :  { %v476_v44 = vpop.permute.xlu1 %475 }
 0x326   :  { %481 = vst.msk [vmem:[#allocation2] sm:$0x1] %vm1771_vm7, %v476_v44 }
 0x329   :  { %v444_v10 = vpop.f32.mrf.mxu2 }
 0x32a   :  { %v810_v48 = vld [vmem:[#allocation1 + $0x2] ss:$9 sm:$0xff] }
 0x32b   :  { %815 = vst [vmem:[#allocation1] sm:$0xff] %v1697_v52 }
 0x332   :  { %v817_v50 = vld [vmem:[#allocation1 + $0x3] ss:$9 sm:$0xff] }
 0x333   :  { %822 = vst [vmem:[#allocation1] sm:$0xff] %v1697_v52 }
 0x335   :  { %v1828_v20 = vpop.permute.xlu1 %495 }
 0x337   :  { %v943_v53 = vpop.xlane.xlu0 %942 }
 0x338   :  { %v944_v54 = vsub.f32 %v1714_v5, %v943_v53 }
 0x33a   :  { %v945_v57 = vmul.f32 1.442695, %v944_v54  ;;  %v824_v58 = vld [vmem:[#allocation1 + $0x4] ss:$9 sm:$0xff]  ;;  %v2159_v54 = vmov 0 }
 0x33b   :  { %829 = vst [vmem:[#allocation1] sm:$0xff] %v1697_v52 }
 0x33c   :  { %1457 = vpow2.f32 %v945_v57 }
 0x342   :  { %v1781_v61 = vpop.eup %1457  ;;  %v831_v63 = vld [vmem:[#allocation1 + $0x5] ss:$9 sm:$0xff] }
 0x343   :  { %v947_v0 = vsel %vm285_vm1, %v1781_v61, 0.0  ;;  %836 = vst [vmem:[#allocation1] sm:$0xff] %v1697_v52 }
 0x344   :  { %948 = vadd.xlane.f32.xlu1 %v947_v0 }
 0x34a   :  { %v1786_v2 = vld [vmem:[#allocation1 + $0x6] ss:$9 sm:$0xff] }
 0x34b   :  { %843 = vst [vmem:[#allocation1] sm:$0xff] %v1697_v52 }
 0x352   :  { %v1789_v5 = vld [vmem:[#allocation1 + $0x7] ss:$9 sm:$0xff] }
 0x353   :  { %855 = vst [vmem:[#allocation1] sm:$0xff] %v1701_v55 }
 0x35a   :  { %v1792_v7 = vld [vmem:[#allocation1 + $0x1] ss:$9 sm:$0xff] }
 0x35b   :  { %862 = vst [vmem:[#allocation1] sm:$0xff] %v1701_v55 }
 0x35d   :  { %605 = vrot.lane.b32.xlu1 %v604_v37, %s1516_s1 }
 0x362   :  { %v1796_v9 = vld [vmem:[#allocation1 + $0x2] ss:$9 sm:$0xff] }
 0x363   :  { %869 = vst [vmem:[#allocation1] sm:$0xff] %v1701_v55 }
 0x365   :  { %612 = vrot.lane.b32.xlu1 %v611_v41, %s1517_s24 }
 0x36a   :  { %v1800_v12 = vld [vmem:[#allocation1 + $0x3] ss:$9 sm:$0xff] }
 0x36b   :  { %876 = vst [vmem:[#allocation1] sm:$0xff] %v1701_v55 }
 0x36d   :  { %797 = vrot.lane.b32.xlu1 %v1697_v52, %s1518_s25 }
 0x372   :  { %v1805_v13 = vld [vmem:[#allocation1 + $0x4] ss:$9 sm:$0xff] }
 0x373   :  { %883 = vst [vmem:[#allocation1] sm:$0xff] %v1701_v55 }
 0x375   :  { %804 = vrot.lane.b32.xlu1 %v803_v19, %s1521_s28 }
 0x37a   :  { %v885_v15 = vld [vmem:[#allocation1 + $0x5] ss:$9 sm:$0xff] }
 0x37b   :  { %888 = vst [vmem:[#allocation1] sm:$0xff] %v1701_v55 }
 0x37c   :  { %887 = vst.msk [vmem:[#allocation2 + $0x2] sm:$0x1] %vm1688_vm11, %v885_v15  ;;  %vm566_vm11 = vcmp.ge.s32.totalorder %v446_v45, 96 }
 0x37d   :  { %811 = vrot.lane.b32.xlu1 %v810_v48, %s1519_s26  ;;  %v1303_v48 = vld [vmem:[%s2131_s3 + $0x30] sm:$0xff] }
 0x382   :  { %v1813_v16 = vld [vmem:[#allocation1 + $0x6] ss:$9 sm:$0xff] }
 0x383   :  { %895 = vst [vmem:[#allocation1] sm:$0xff] %v1701_v55 }
 0x385   :  { %818 = vrot.lane.b32.xlu1 %v817_v50, %s1520_s27 }
 0x38a   :  { %v1817_v52 = vld [vmem:[#allocation1 + $0x7] ss:$9 sm:$0xff] }
 0x38b   :  { %907 = vst [vmem:[#allocation1] sm:$0xff] %v1705_v59 }
 0x38d   :  { %515 = vrot.lane.b32.xlu1 %v1722_v11, %s1522_s29  ;;  %v1833_v11 = vpop.permute.xlu1 %505 }
 0x391   :  { %v982_v21 = vpop.trf.xlu0 }
 0x392   :  { %v1822_v3 = vld [vmem:[#allocation1 + $0x1] ss:$9 sm:$0xff] }
 0x393   :  { %914 = vst [vmem:[#allocation1] sm:$0xff] %v1705_v59 }
 0x395   :  { %825 = vrot.lane.b32.xlu1 %v824_v58, %s1522_s29 }
 0x399   :  { %v983_v22 = vpop.trf.xlu0 }
 0x39a   :  { %v916_v1 = vld [vmem:[#allocation1 + $0x2] ss:$9 sm:$0xff] }
 0x39d   :  { %523 = vrot.lane.b32.xlu1 %v1695_v51, %s1523_s30 }
 0x3a1   :  { %v984_v59 = vpop.trf.xlu0 }
 0x3a5   :  { %832 = vrot.lane.b32.xlu1 %v831_v63, %s1523_s30 }
 0x3a9   :  { %v985_v51 = vpop.trf.xlu0 }
 0x3ad   :  { %533 = vrot.lane.b32.xlu1 %v1726_v14, %s1515_s21 }
 0x3b5   :  { %543 = vrot.lane.b32.xlu1 %v1730_v17, %s1524_s5  ;;  %v986_v17 = vpop.trf.xlu0 }
 0x3b7   :  { %v949_v24 = vpop.xlane.xlu1 %948 }
 0x3b8   :  { %1459 = vrcp.f32 %v949_v24  ;;  %v961_v31 = vand.u32 2147483648, %v949_v24  ;;  %v959_v32 = vand.u32 2147483647, %v949_v24  ;;  %vm955_vm9 = vweird.f32 %v949_v24 }
 0x3ba   :  { %v962_v37 = vor.u32 1.1754944e-38, %v961_v31  ;;  %vm960_vm12 = vcmp.eq.f32.partialorder %v959_v32, 8.507059e+37 }
 0x3bd   :  { %553 = vrot.lane.b32.xlu1 %v1735_v23, %s1525_s6 }
 0x3be   :  { %v1460_v25 = vpop.eup %1459 }
 0x3bf   :  { %v951_v27 = vmul.f32 %v1460_v25, %v949_v24  ;;  %vm956_vm8 = vweird.f32 %v1460_v25 }
 0x3c0   :  { %vm957_vm10 = vmor %vm955_vm9, %vm956_vm8  ;;  %vm508_vm8 = vcmp.ge.s32.totalorder %v446_v45, 48  ;;  %vm509_vm9 = vcmp.lt.s32.totalorder %v446_v45, 56 }
 0x3c1   :  { %v952_v29 = vsub.f32 1.0, %v951_v27 }
 0x3c3   :  { %v953_v14 = vmul.f32 %v1460_v25, %v952_v29 }
 0x3c5   :  { %v954_v34 = vadd.f32 %v1460_v25, %v953_v14  ;;  %851 = vrot.lane.b32.xlu1 %v1701_v55, %s1525_s6  ;;  %v987_v55 = vpop.trf.xlu0 }
 0x3c7   :  { %v958_v39 = vsel %vm957_vm10, %v1460_v25, %v954_v34  ;;  %vm1898_vm10 = vmand %vm508_vm8, %vm509_vm9  ;;  %vm536_vm9 = vcmp.ge.s32.totalorder %v446_v45, 72 }
 0x3c8   :  { %v963_v40 = vsel %vm960_vm12, %v962_v37, %v958_v39  ;;  %vm518_vm12 = vcmp.ge.s32.totalorder %v446_v45, 56  ;;  %vm1926_vm8 = vmand %vm526_vm2, %vm527_vm4  ;;  %vm547_vm2 = vcmp.lt.s32.totalorder %v446_v45, 88  ;;  %vm557_vm4 = vcmp.lt.s32.totalorder %v446_v45, 96 }
 0x3c9   :  { %v964_v23 = vmul.f32 %v1781_v61, %v963_v40  ;;  %v1301_v61 = vld [vmem:[%s2131_s3 + $0x20] sm:$0xff] }
 0x3cb   :  { %v965_v41 = vsel %vm36_vm6, %v964_v23, -9e+15  ;;  %vm488_vm6 = vcmp.ge.s32.totalorder %v446_v45, 32 }
 0x3cc   :  { %1395 = vmatpush.xpose.msk.msra.mxu1 %vm285_vm1, %v965_v41  ;;  %1416 = vmatpush.xpose.msk.msrb.mxu3 %vm285_vm1, %v965_v41  ;;  %vm1874_vm15 = vmand %vm488_vm6, %vm489_vm13  ;;  %vm519_vm6 = vcmp.lt.s32.totalorder %v446_v45, 64 }
 0x3cd   :  { %563 = vrot.lane.b32.xlu1 %v1740_v26, %s1526_s7  ;;  %v988_v18 = vpop.trf.xlu0  ;;  %vm1912_vm13 = vmand %vm518_vm12, %vm519_vm6  ;;  %vm537_vm12 = vcmp.lt.s32.totalorder %v446_v45, 80  ;;  %vm546_vm6 = vcmp.ge.s32.totalorder %v446_v45, 80 }
 0x3ce   :  { %v2160_v54 = vsel %vm1912_vm13, 4294967295, %v2159_v54  ;;  %vm1951_vm0 = vmand %vm536_vm9, %vm537_vm12 }
 0x3cf   :  { %1396 = vmatmul.msk.f32.vlgmr.msra.gmra.mxu1 %vm285_vm1, %v982_v21  ;;  %v606_v42 = vpop.permute.xlu1 %605  ;;  %1399 = vmatmul.msk.f32.vlgmr.msrb.gmra.mxu3 %vm285_vm1, %v985_v51 }
 0x3d0   :  { %608 = vst.msk [vmem:[#allocation2 + $0x1] sm:$0x1] %vm1753_vm14, %v606_v42 }
 0x3d3   :  { %485 = vrot.lane.b32.xlu0 %v1711_v62, %s1521_s28 }
 0x3d5   :  { %573 = vrot.lane.b32.xlu1 %v1743_v28, %s1527_s8  ;;  %v989_v62 = vpop.trf.xlu0  ;;  %v2153_v28 = vmov 0 }
 0x3d6   :  { %v2154_v28 = vsel %vm1874_vm15, 4294967295, %v2153_v28 }
 0x3d7   :  { %v613_v43 = vpop.permute.xlu1 %612  ;;  %1397 = vmatmul.msk.f32.gmra.mxu1 %vm285_vm1, %v983_v22  ;;  %1400 = vmatmul.msk.f32.gmra.mxu3 %vm285_vm1, %v986_v17 }
 0x3d8   :  { %615 = vst.msk [vmem:[#allocation2 + $0x1] sm:$0x1] %vm1762_vm3, %v613_v43  ;;  %vm577_vm3 = vcmp.lt.s32.totalorder %v446_v45, 112 }
 0x3db   :  { %865 = vrot.lane.b32.xlu0 %v1796_v9, %s1527_s8 }
 0x3dd   :  { %583 = vrot.lane.b32.xlu1 %v1746_v30, %s1528_s9  ;;  %v990_v19 = vpop.trf.xlu0 }
 0x3df   :  { %v798_v26 = vpop.permute.xlu1 %797  ;;  %1398 = vmatmul.msk.f32.gmra.mxu1 %vm285_vm1, %v984_v59  ;;  %1401 = vmatmul.msk.f32.gmra.mxu3 %vm285_vm1, %v987_v55 }
 0x3e0   :  { %800 = vst.msk [vmem:[#allocation2 + $0x1] sm:$0x1] %vm1771_vm7, %v798_v26  ;;  %vm576_vm7 = vcmp.ge.s32.totalorder %v446_v45, 104 }
 0x3e3   :  { %872 = vrot.lane.b32.xlu0 %v1800_v12, %s1528_s9 }
 0x3e5   :  { %593 = vrot.lane.b32.xlu1 %v1749_v33, %s1529_s10  ;;  %v2155_v33 = vmov 0  ;;  %v991_v46 = vpop.trf.xlu0 }
 0x3e6   :  { %v2156_v33 = vsel %vm1887_vm5, 4294967295, %v2155_v33 }
 0x3e7   :  { %v805_v30 = vpop.permute.xlu1 %804  ;;  %1402 = vmatmul.msk.f32.gmra.mxu3 %vm285_vm1, %v988_v18 }
 0x3e8   :  { %807 = vst.msk [vmem:[#allocation2 + $0x1] sm:$0x1] %vm1874_vm15, %v805_v30 }
 0x3eb   :  { %879 = vrot.lane.b32.xlu0 %v1805_v13, %s1529_s10 }
 0x3ed   :  { %839 = vrot.lane.b32.xlu1 %v1786_v2, %s1515_s21  ;;  %v992_v50 = vpop.trf.xlu0 }
 0x3ef   :  { %v812_v44 = vpop.permute.xlu1 %811  ;;  %1403 = vmatmul.msk.f32.gmra.mxu3 %vm285_vm1, %v989_v62  ;;  %v904_v62 = vpop.permute.xlu2 %903 }
 0x3f0   :  { %814 = vst.msk [vmem:[#allocation2 + $0x1] sm:$0x1] %vm1887_vm5, %v812_v44 }
 0x3f5   :  { %846 = vrot.lane.b32.xlu1 %v1789_v5, %s1524_s5  ;;  %v993_v56 = vpop.trf.xlu0 }
 0x3f7   :  { %v819_v49 = vpop.permute.xlu1 %818  ;;  %1404 = vmatmul.msk.f32.gmra.mxu3 %vm285_vm1, %v990_v19 }
 0x3f8   :  { %821 = vst.msk [vmem:[#allocation2 + $0x1] sm:$0x1] %vm1898_vm10, %v819_v49 }
 0x3fd   :  { %858 = vrot.lane.b32.xlu1 %v1792_v7, %s1526_s7  ;;  %v994_v60 = vpop.trf.xlu0 }
 0x3ff   :  { %v516_v53 = vpop.permute.xlu1 %515  ;;  %1405 = vmatmul.msk.f32.gmra.mxu3 %vm285_vm1, %v991_v46 }
 0x405   :  { %891 = vrot.lane.b32.xlu1 %v1813_v16, %s1516_s1  ;;  %v995_v0 = vpop.trf.xlu0 }
 0x407   :  { %v826_v57 = vpop.permute.xlu1 %825  ;;  %1406 = vmatmul.msk.f32.gmra.mxu3 %vm285_vm1, %v992_v50 }
 0x408   :  { %828 = vst.msk [vmem:[#allocation2 + $0x1] sm:$0x1] %vm1912_vm13, %v826_v57 }
 0x40d   :  { %898 = vrot.lane.b32.xlu1 %v1817_v52, %s1517_s24  ;;  %v996_v4 = vpop.trf.xlu0 }
 0x40f   :  { %v524_v58 = vpop.permute.xlu1 %523  ;;  %1407 = vmatmul.msk.f32.gmra.mxu3 %vm285_vm1, %v993_v56 }
 0x415   :  { %910 = vrot.lane.b32.xlu1 %v1822_v3, %s1521_s28  ;;  %v997_v6 = vpop.trf.xlu0 }
 0x417   :  { %v833_v63 = vpop.permute.xlu1 %832  ;;  %1408 = vmatmul.msk.f32.gmra.mxu3 %vm285_vm1, %v994_v60 }
 0x418   :  { %835 = vst.msk [vmem:[#allocation2 + $0x1] sm:$0x1] %vm1926_vm8, %v833_v63 }
 0x41d   :  { %917 = vrot.lane.b32.xlu1 %v916_v1, %s1519_s26 }
 0x41f   :  { %v534_v2 = vpop.permute.xlu1 %533  ;;  %1409 = vmatmul.msk.f32.gmra.mxu3 %vm285_vm1, %v995_v0 }
 0x427   :  { %v544_v5 = vpop.permute.xlu1 %543  ;;  %1410 = vmatmul.msk.f32.gmra.mxu3 %vm285_vm1, %v996_v4 }
 0x42f   :  { %v554_v7 = vpop.permute.xlu1 %553  ;;  %1411 = vmatmul.msk.f32.gmra.mxu3 %vm285_vm1, %v997_v6  ;;  %vm556_vm1 = vcmp.ge.s32.totalorder %v446_v45, 88 }
 0x430   :  { %vm1967_vm9 = vmand %vm556_vm1, %vm557_vm4  ;;  %vm2177_vm1 = vnez %v2150_v36  ;;  %vm2178_vm4 = vnez %v2152_v35 }
 0x437   :  { %v852_v8 = vpop.permute.xlu1 %851 }
 0x43f   :  { %v564_v9 = vpop.permute.xlu1 %563 }
 0x445   :  { %v486_v10 = vpop.permute.xlu0 %485 }
 0x446   :  { %491 = vst.msk [vmem:[#allocation2] sm:$0x1] %vm1874_vm15, %v486_v10  ;;  %vm567_vm15 = vcmp.lt.s32.totalorder %v446_v45, 104 }
 0x447   :  { %501 = vst.msk [vmem:[#allocation2] sm:$0x1] %vm1887_vm5, %v1828_v20  ;;  %v574_v12 = vpop.permute.xlu1 %573  ;;  %vm1959_vm5 = vmand %vm546_vm6, %vm547_vm2  ;;  %vm586_vm6 = vcmp.ge.s32.totalorder %v446_v45, 112  ;;  %vm587_vm2 = vcmp.lt.s32.totalorder %v446_v45, 120 }
 0x448   :  { %511 = vst.msk [vmem:[#allocation2] sm:$0x1] %vm1898_vm10, %v1833_v11  ;;  %vm1973_vm12 = vmand %vm566_vm11, %vm567_vm15 }
 0x449   :  { %521 = vst.msk [vmem:[#allocation2] sm:$0x1] %vm1912_vm13, %v516_v53  ;;  %vm1981_vm13 = vmand %vm576_vm7, %vm577_vm3  ;;  %vm596_vm3 = vcmp.ge.s32.totalorder %v446_v45, 120  ;;  %vm597_vm7 = vcmp.lt.s32.totalorder %v446_v45, 128 }
 0x44a   :  { %529 = vst.msk [vmem:[#allocation2] sm:$0x1] %vm1926_vm8, %v524_v58  ;;  %vm1990_vm11 = vmand %vm586_vm6, %vm587_vm2  ;;  %vm2179_vm6 = vnez %v2154_v28  ;;  %vm2180_vm2 = vnez %v2156_v33  ;;  %v1304_v33 = vld [vmem:[%s2131_s3 + $0x38] sm:$0x1] }
 0x44b   :  { %539 = vst.msk [vmem:[#allocation2] sm:$0x1] %vm1951_vm0, %v534_v2  ;;  %vm2000_vm15 = vmand %vm596_vm3, %vm597_vm7  ;;  %vm2181_vm3 = vnez %v2146_v47  ;;  %vm2182_vm7 = vnez %v2160_v54  ;;  %v1302_v54 = vld [vmem:[%s2131_s3 + $0x28] sm:$0xff] }
 0x44c   :  { %549 = vst.msk [vmem:[#allocation2] sm:$0x1] %vm1959_vm5, %v544_v5  ;;  %v1066_v20 = vpop.f32.mrf.mxu1 }
 0x44d   :  { %559 = vst.msk [vmem:[#allocation2] sm:$0x1] %vm1967_vm9, %v554_v7  ;;  %1102 = vrot.lane.b32.xlu1 %v1066_v20, %s1520_s27  ;;  %v866_v29 = vpop.permute.xlu0 %865 }
 0x44e   :  { %569 = vst.msk [vmem:[#allocation2] sm:$0x1] %vm1973_vm12, %v564_v9 }
 0x44f   :  { %579 = vst.msk [vmem:[#allocation2] sm:$0x1] %vm1981_vm13, %v574_v12  ;;  %v584_v22 = vpop.permute.xlu1 %583 }
 0x450   :  { %1106 = vst [vmem:[#allocation1] sm:$0xff] %v1066_v20 }
 0x451   :  { %589 = vst.msk [vmem:[#allocation2] sm:$0x1] %vm1990_vm11, %v584_v22 }
 0x452   :  { %v1075_v11 = vpop.f32.mrf.mxu3 }
 0x454   :  { %v2007_v27 = vpop.f32.mrf.mxu1 }
 0x455   :  { %v873_v34 = vpop.permute.xlu0 %872 }
 0x457   :  { %v1108_v24 = vld [vmem:[#allocation1 + $0x1] ss:$9 sm:$0xff]  ;;  %v594_v51 = vpop.permute.xlu1 %593 }
 0x458   :  { %1109 = vrot.lane.b32.xlu1 %v1108_v24, %s1522_s29  ;;  %1113 = vst [vmem:[#allocation1] sm:$0xff] %v1066_v20 }
 0x459   :  { %599 = vst.msk [vmem:[#allocation2] sm:$0x1] %vm2000_vm15, %v594_v51 }
 0x45a   :  { %v1077_v25 = vpop.f32.mrf.mxu3 }
 0x45c   :  { %v1072_v5 = vpop.f32.mrf.mxu1 }
 0x45d   :  { %v880_v23 = vpop.permute.xlu0 %879 }
 0x45f   :  { %v840_v31 = vpop.permute.xlu1 %839  ;;  %v1115_v14 = vld [vmem:[#allocation1 + $0x2] ss:$9 sm:$0xff] }
 0x460   :  { %1156 = vrot.lane.b32.xlu1 %v2007_v27, %s1528_s9  ;;  %842 = vst.msk [vmem:[#allocation2 + $0x1] sm:$0x1] %vm1951_vm0, %v840_v31  ;;  %v1444_v12 = vld [vmem:[#allocation2] ss:$0 sm:$0xff] }
 0x461   :  { %1120 = vst [vmem:[#allocation1] sm:$0xff] %v1066_v20 }
 0x462   :  { %v1079_v45 = vpop.f32.mrf.mxu3 }
 0x467   :  { %v847_v32 = vpop.permute.xlu1 %846 }
 0x468   :  { %1116 = vrot.lane.b32.xlu1 %v1115_v14, %s1523_s30  ;;  %849 = vst.msk [vmem:[#allocation2 + $0x1] sm:$0x1] %vm1959_vm5, %v847_v32  ;;  %v1122_v17 = vld [vmem:[#allocation1 + $0x3] ss:$9 sm:$0xff] }
 0x469   :  { %854 = vst.msk [vmem:[#allocation2 + $0x1] sm:$0x1] %vm1967_vm9, %v852_v8 }
 0x46a   :  { %1127 = vst [vmem:[#allocation1] sm:$0xff] %v1066_v20  ;;  %v1081_v37 = vpop.f32.mrf.mxu3 }
 0x46f   :  { %v859_v39 = vpop.permute.xlu1 %858 }
 0x470   :  { %1123 = vrot.lane.b32.xlu1 %v1122_v17, %s1515_s21  ;;  %861 = vst.msk [vmem:[#allocation2 + $0x1] sm:$0x1] %vm1973_vm12, %v859_v39 }
 0x471   :  { %868 = vst.msk [vmem:[#allocation2 + $0x1] sm:$0x1] %vm1981_vm13, %v866_v29  ;;  %v1129_v40 = vld [vmem:[#allocation1 + $0x4] ss:$9 sm:$0xff] }
 0x472   :  { %875 = vst.msk [vmem:[#allocation2 + $0x1] sm:$0x1] %vm1990_vm11, %v873_v34  ;;  %v1083_v41 = vpop.f32.mrf.mxu3 }
 0x473   :  { %882 = vst.msk [vmem:[#allocation2 + $0x1] sm:$0x1] %vm2000_vm15, %v880_v23  ;;  %v1299_v23 = vld [vmem:[%s2131_s3 + $0x10] sm:$0xff]  ;;  %v1298_v41 = vld [vmem:[%s2131_s3 + $0x8] sm:$0xff] }
 0x474   :  { %1134 = vst [vmem:[#allocation1] sm:$0xff] %v1066_v20 }
 0x477   :  { %v892_v55 = vpop.permute.xlu1 %891 }
 0x478   :  { %1130 = vrot.lane.b32.xlu1 %v1129_v40, %s1524_s5  ;;  %894 = vst.msk [vmem:[#allocation2 + $0x2] sm:$0x1] %vm1753_vm14, %v892_v55  ;;  %v1300_v40 = vld [vmem:[%s2131_s3 + $0x18] sm:$0xff]  ;;  %v1297_v55 = vld [vmem:[%s2131_s3] sm:$0xff] }
 0x47a   :  { %v1085_v42 = vpop.f32.mrf.mxu3  ;;  %v1227_v9 = vld [vmem:[#allocation2] sm:$0x3] }
 0x47b   :  { %v1136_v18 = vld [vmem:[#allocation1 + $0x5] ss:$9 sm:$0xff]  ;;  %v1239_v22 = vperm.slane %v1227_v9, 0  ;;  %v1240_v51 = vperm.slane %v1227_v9, 1 }
 0x47c   :  { %1141 = vst [vmem:[#allocation1] sm:$0xff] %v1066_v20  ;;  %v1445_v24 = vld [vmem:[#allocation2 + $0x1] ss:$0 sm:$0xff] }
 0x47f   :  { %v899_v43 = vpop.permute.xlu1 %898 }
 0x480   :  { %1137 = vrot.lane.b32.xlu1 %v1136_v18, %s1525_s6  ;;  %901 = vst.msk [vmem:[#allocation2 + $0x2] sm:$0x1] %vm2177_vm1, %v899_v43 }
 0x481   :  { %906 = vst.msk [vmem:[#allocation2 + $0x2] sm:$0x1] %vm2178_vm4, %v904_v62 }
 0x482   :  { %v1087_v26 = vpop.f32.mrf.mxu3 }
 0x483   :  { %v1143_v30 = vld [vmem:[#allocation1 + $0x6] ss:$9 sm:$0xff]  ;;  %v1226_v26 = vld [vmem:[#allocation2] sm:$0x1] }
 0x484   :  { %1148 = vst [vmem:[#allocation1] sm:$0xff] %v1066_v20 }
 0x487   :  { %v911_v19 = vpop.permute.xlu1 %910 }
 0x488   :  { %1144 = vrot.lane.b32.xlu1 %v1143_v30, %s1526_s7  ;;  %913 = vst.msk [vmem:[#allocation2 + $0x2] sm:$0x1] %vm2179_vm6, %v911_v19  ;;  %s1537_s7 = smov [#allocation6]  }
 0x48a   :  { %v1089_v44 = vpop.f32.mrf.mxu3 }
 0x48b   :  { %v1150_v46 = vld [vmem:[#allocation1 + $0x7] ss:$9 sm:$0xff] }
 0x48c   :  { %1160 = vst [vmem:[#allocation1] sm:$0xff] %v2007_v27 }
 0x48f   :  { %v918_v49 = vpop.permute.xlu1 %917 }
 0x490   :  { %1151 = vrot.lane.b32.xlu1 %v1150_v46, %s1527_s8  ;;  %920 = vst.msk [vmem:[#allocation2 + $0x2] sm:$0x1] %vm2180_vm2, %v918_v49  ;;  %s1340_s8 = sshll.u32 %s1537_s7, 4  ;;  %s1341_s8 = int_to_ptr.vmem [resolvable:$true] %s1340_s8 }
 0x492   :  { %v1091_v50 = vpop.f32.mrf.mxu3 }
 0x493   :  { %v1162_v53 = vld [vmem:[#allocation1 + $0x1] ss:$9 sm:$0xff] }
 0x494   :  { %1167 = vst [vmem:[#allocation1] sm:$0xff] %v2007_v27 }
 0x498   :  { %1163 = vrot.lane.b32.xlu1 %v1162_v53, %s1529_s10 }
 0x49a   :  { %v1093_v56 = vpop.f32.mrf.mxu3 }
 0x49b   :  { %v1169_v57 = vld [vmem:[#allocation1 + $0x2] ss:$9 sm:$0xff] }
 0x49c   :  { %1171 = vst.msk [vmem:[#allocation2 + $0x3] sm:$0x1] %vm2181_vm3, %v1169_v57 }
 0x49d   :  { %1172 = vst [vmem:[#allocation1] sm:$0xff] %v2007_v27 }
 0x4a2   :  { %v1095_v58 = vpop.f32.mrf.mxu3 }
 0x4a4   :  { %v1174_v60 = vld [vmem:[#allocation1 + $0x3] ss:$9 sm:$0xff] }
 0x4a5   :  { %1175 = vrot.lane.b32.xlu0 %v1174_v60, %s1516_s1  ;;  %1179 = vst [vmem:[#allocation1] sm:$0xff] %v2007_v27 }
 0x4aa   :  { %v1097_v63 = vpop.f32.mrf.mxu3 }
 0x4ac   :  { %v1181_v0 = vld [vmem:[#allocation1 + $0x4] ss:$9 sm:$0xff] }
 0x4ad   :  { %1182 = vrot.lane.b32.xlu0 %v1181_v0, %s1517_s24  ;;  %1186 = vst [vmem:[#allocation1] sm:$0xff] %v2007_v27 }
 0x4b2   :  { %v1099_v1 = vpop.f32.mrf.mxu3 }
 0x4b4   :  { %v1188_v2 = vld [vmem:[#allocation1 + $0x5] ss:$9 sm:$0xff] }
 0x4b5   :  { %1189 = vrot.lane.b32.xlu0 %v1188_v2, %s1518_s25  ;;  %1193 = vst [vmem:[#allocation1] sm:$0xff] %v2007_v27 }
 0x4bc   :  { %v1195_v47 = vld [vmem:[#allocation1 + $0x6] ss:$9 sm:$0xff] }
 0x4bd   :  { %1196 = vrot.lane.b32.xlu0 %v1195_v47, %s1521_s28  ;;  %1200 = vst [vmem:[#allocation1] sm:$0xff] %v2007_v27 }
 0x4bf   :  { %v1103_v4 = vpop.permute.xlu1 %1102 }
 0x4c0   :  { %1105 = vst.msk [vmem:[#allocation2 + $0x2] sm:$0x1] %vm1898_vm10, %v1103_v4  ;;  %v1448_v4 = vld [vmem:[%s2131_s3 + $0x39] ss:$0 sm:$0xff] }
 0x4c4   :  { %v1202_v6 = vld [vmem:[#allocation1 + $0x7] ss:$9 sm:$0xff] }
 0x4c5   :  { %1203 = vrot.lane.b32.xlu0 %v1202_v6, %s1519_s26  ;;  %1212 = vst [vmem:[#allocation1] sm:$0xff] %v1072_v5 }
 0x4ca   :  { %v1110_v7 = vpop.permute.xlu1 %1109 }
 0x4cb   :  { %1112 = vst.msk [vmem:[#allocation2 + $0x2] sm:$0x1] %vm2182_vm7, %v1110_v7 }
 0x4cc   :  { %v1214_v8 = vld [vmem:[#allocation1 + $0x1] ss:$9 sm:$0xff] }
 0x4cd   :  { %1208 = vrot.lane.b32.xlu0 %v1072_v5, %s1520_s27  ;;  %1215 = vrot.lane.b32.xlu1 %v1214_v8, %s1522_s29  ;;  %1219 = vst [vmem:[#allocation1] sm:$0xff] %v1072_v5 }
 0x4d2   :  { %v1157_v10 = vpop.permute.xlu1 %1156 }
 0x4d4   :  { %v1221_v20 = vld [vmem:[#allocation1 + $0x2] ss:$9 sm:$0xff] }
 0x4d5   :  { %1222 = vrot.lane.b32.xlu2 %v1221_v20, %s1523_s30  ;;  %1235 = vrot.lane.b32.xlu0 %v1444_v12, %s1530_s11  ;;  %s1342_s11 = sshll.u32 %s2132_s4, 4  ;;  %s1343_s11 = int_to_ptr.hbm [resolvable:$true] %s1342_s11 }
 0x4d6   :  { %1241 = vrot.lane.b32.xlu1 %v1239_v22, %s1531_s12 }
 0x4da   :  { %v1117_v11 = vpop.permute.xlu1 %1116 }
 0x4db   :  { %1119 = vst.msk [vmem:[#allocation2 + $0x2] sm:$0x1] %vm1926_vm8, %v1117_v11 }
 0x4dd   :  { %1250 = vrot.lane.b32.xlu0 %v1445_v24, %s1532_s13  ;;  %1243 = vrot.lane.b32.xlu2 %v1240_v51, %s1531_s12 }
 0x4e2   :  { %v1124_v25 = vpop.permute.xlu1 %1123 }
 0x4e3   :  { %1126 = vst.msk [vmem:[#allocation2 + $0x2] sm:$0x1] %vm1951_vm0, %v1124_v25  ;;  %vm1283_vm0 = vcmask 1040384  }
 0x4e4   :  { %1412 = vmatpush.msk.msrb.mxu1 %vm1283_vm0, %v1304_v33 }
 0x4e6   :  { %1323 = vmatpush.msrb.mxu1 %v1303_v48 }
 0x4e8   :  { %1324 = vmatpush.msrb.mxu1 %v1302_v54 }
 0x4ea   :  { %v1131_v27 = vpop.permute.xlu1 %1130  ;;  %1325 = vmatpush.msrb.mxu1 %v1301_v61 }
 0x4eb   :  { %1133 = vst.msk [vmem:[#allocation2 + $0x2] sm:$0x1] %vm1959_vm5, %v1131_v27  ;;  %vm1260_vm5 = vcmask 228352  }
 0x4ec   :  { %1326 = vmatpush.msrb.mxu1 %v1300_v40 }
 0x4ee   :  { %1327 = vmatpush.msrb.mxu1 %v1299_v23 }
 0x4f0   :  { %1328 = vmatpush.msrb.mxu1 %v1298_v41 }
 0x4f2   :  { %v1138_v29 = vpop.permute.xlu1 %1137  ;;  %1329 = vmatpush.msrb.mxu1 %v1297_v55 }
 0x4f3   :  { %1140 = vst.msk [vmem:[#allocation2 + $0x2] sm:$0x1] %vm1967_vm9, %v1138_v29  ;;  %vm1275_vm9 = vcmask 343040  }
 0x4fa   :  { %v1145_v31 = vpop.permute.xlu1 %1144 }
 0x4fb   :  { %1147 = vst.msk [vmem:[#allocation2 + $0x2] sm:$0x1] %vm1973_vm12, %v1145_v31  ;;  %vm1291_vm12 = vcmask 1044480  }
 0x502   :  { %v1152_v14 = vpop.permute.xlu1 %1151 }
 0x503   :  { %1154 = vst.msk [vmem:[#allocation2 + $0x2] sm:$0x1] %vm1981_vm13, %v1152_v14  ;;  %vm1287_vm13 = vcmask 1042432  }
 0x504   :  { %1159 = vst.msk [vmem:[#allocation2 + $0x2] sm:$0x1] %vm1990_vm11, %v1157_v10  ;;  %vm1293_vm11 = vcmask 1045504  }
 0x50a   :  { %v1164_v13 = vpop.permute.xlu1 %1163 }
 0x50b   :  { %1166 = vst.msk [vmem:[#allocation2 + $0x2] sm:$0x1] %vm2000_vm15, %v1164_v13  ;;  %vm1295_vm15 = vcmask 1046528  }
 0x512   :  { %v1446_v15 = vld [vmem:[#allocation2 + $0x2] ss:$0 sm:$0xff] }
 0x513   :  { %v1229_v45 = vld [vmem:[#allocation2 + $0x1] sm:$0x3]  ;;  %1265 = vrot.lane.b32.xlu0 %v1446_v15, %s1533_s14 }
 0x514   :  { %v1255_v32 = vperm.slane %v1229_v45, 1  ;;  %v1254_v16 = vperm.slane %v1229_v45, 0 }
 0x516   :  { %1258 = vrot.lane.b32.xlu2 %v1255_v32, %s1534_s15  ;;  %1256 = vrot.lane.b32.xlu1 %v1254_v16, %s1534_s15 }
 0x517   :  { %v1176_v52 = vpop.permute.xlu0 %1175 }
 0x518   :  { %1178 = vst.msk [vmem:[#allocation2 + $0x3] sm:$0x1] %vm1753_vm14, %v1176_v52  ;;  %vm1245_vm14 = vcmask 113664  }
 0x51f   :  { %v1183_v3 = vpop.permute.xlu0 %1182 }
 0x520   :  { %1185 = vst.msk [vmem:[#allocation2 + $0x3] sm:$0x1] %vm2177_vm1, %v1183_v3  ;;  %vm1307_vm1 = vcmask 465920  }
 0x527   :  { %v1190_v21 = vpop.permute.xlu0 %1189 }
 0x528   :  { %1192 = vst.msk [vmem:[#allocation2 + $0x3] sm:$0x1] %vm2178_vm4, %v1190_v21  ;;  %vm2183_vm4 = vcmask 130048  }
 0x52f   :  { %v1197_v59 = vpop.permute.xlu0 %1196  ;;  %v1223_v38 = vpop.permute.xlu2 %1222 }
 0x530   :  { %1199 = vst.msk [vmem:[#allocation2 + $0x3] sm:$0x1] %vm2179_vm6, %v1197_v59 }
 0x537   :  { %v1204_v34 = vpop.permute.xlu0 %1203  ;;  %v1244_v18 = vpop.permute.xlu2 %1243 }
 0x538   :  { %1206 = vst.msk [vmem:[#allocation2 + $0x3] sm:$0x1] %vm2180_vm2, %v1204_v34 }
 0x53f   :  { %v1209_v17 = vpop.permute.xlu0 %1208  ;;  %v1216_v37 = vpop.permute.xlu1 %1215 }
 0x540   :  { %1211 = vst.msk [vmem:[#allocation2 + $0x3] sm:$0x1] %vm1898_vm10, %v1209_v17  ;;  %vm1285_vm10 = vcmask 1041408  }
 0x541   :  { %1218 = vst.msk [vmem:[#allocation2 + $0x3] sm:$0x1] %vm2182_vm7, %v1216_v37 }
 0x542   :  { %1225 = vst.msk [vmem:[#allocation2 + $0x3] sm:$0x1] %vm1926_vm8, %v1223_v38  ;;  %vm1289_vm8 = vcmask 1043456  }
 0x547   :  { %v1236_v42 = vpop.permute.xlu0 %1235 }
 0x548   :  { %v1242_v43 = vpop.permute.xlu1 %1241  ;;  %v1284_v44 = vsel %vm1283_vm0, %v1226_v26, %v1236_v42 }
 0x549   :  { %v1447_v36 = vld [vmem:[#allocation2 + $0x3] ss:$0 sm:$0xff]  ;;  %v1246_v46 = vsel %vm1245_vm14, %v1242_v43, %v1244_v18 }
 0x54a   :  { %v1231_v35 = vld [vmem:[#allocation2 + $0x2] sm:$0x3]  ;;  %1280 = vrot.lane.b32.xlu0 %v1447_v36, %s1535_s16  ;;  %v1286_v53 = vsel %vm1285_vm10, %v1284_v44, %v1246_v46 }
 0x54b   :  { %v1270_v28 = vperm.slane %v1231_v35, 1  ;;  %v1269_v39 = vperm.slane %v1231_v35, 0 }
 0x54d   :  { %1273 = vrot.lane.b32.xlu2 %v1270_v28, %s1536_s17  ;;  %1271 = vrot.lane.b32.xlu1 %v1269_v39, %s1536_s17 }
 0x54f   :  { %v1251_v62 = vpop.permute.xlu0 %1250 }
 0x550   :  { %v1288_v56 = vsel %vm1287_vm13, %v1286_v53, %v1251_v62 }
 0x570   :  { %v1259_v30 = vpop.permute.xlu2 %1258 }
 0x585   :  { %v1266_v49 = vpop.permute.xlu0 %1265 }
 0x588   :  { %v1257_v19 = vpop.permute.xlu1 %1256 }
 0x589   :  { %v1261_v50 = vsel %vm1260_vm5, %v1257_v19, %v1259_v30 }
 0x58a   :  { %v1290_v57 = vsel %vm1289_vm8, %v1288_v56, %v1261_v50 }
 0x58b   :  { %v1292_v63 = vsel %vm1291_vm12, %v1290_v57, %v1266_v49 }
 0x5a7   :  { %v1274_v58 = vpop.permute.xlu2 %1273 }
 0x5bc   :  { %v1281_v1 = vpop.permute.xlu0 %1280 }
 0x5bf   :  { %v1272_v60 = vpop.permute.xlu1 %1271 }
 0x5c0   :  { %v1276_v0 = vsel %vm1275_vm9, %v1272_v60, %v1274_v58 }
 0x5c1   :  { %v1294_v2 = vsel %vm1293_vm11, %v1292_v63, %v1276_v0 }
 0x5c2   :  { %v1296_v47 = vsel %vm1295_vm15, %v1294_v2, %v1281_v1 }
 0x5c3   :  { %1413 = vmatmul.msk.f32.vlgmr.msrb.gmra.mxu1 %vm1307_vm1, %v1296_v47 }
 0x640   :  { %v1331_v5 = vpop.f32.mrf.mxu1 }
 0x641   :  { %v1332_v6 = vadd.f32 %v1448_v4, %v1331_v5 }
 0x643   :  { %1334 = vst.msk [vmem:[#allocation6] sm:$0xff] %vm2183_vm4, %v1332_v6 }
 0x644   :  { %1345 = dma.vmem_to_hbm [thread:$0]  %s1341_s8, 128, %s1343_s11, [#allocation5]  }
 0x645   :  { %1511 = dma.done.wait [#allocation5], 128  }
 0x646   :  { %1512 = vsyncadd [#allocation5], 4294967168 }
 0x647   :  { %1350 = vsyncpa [#allocation4], 1 }
 0x648   :  { %1351 = vsyncpa [#allocation5], 1 }

</bundles_post_ra>
